<compile_context>
chip_gen: v7x
topology: tpu7x:2x2x1
jax: 0.10.0
libtpu: 0.0.40
codegen_flags: <defaults>
</compile_context>

<pallas_src>
import math
import jax
import jax.numpy as jnp
from jax.experimental import pallas as pl
from jax.experimental.pallas import tpu as pltpu

D_MODEL = 8
N_HEADS = 4
D_KEY = D_MODEL // N_HEADS
D_FFN = D_MODEL * 4
N_LAYERS = 4
LN_EPS = 1e-5  # PyTorch nn.LayerNorm default eps


def _layer_norm(x, w, b):
    mu = jnp.mean(x, axis=-1, keepdims=True)
    var = jnp.mean((x - mu) ** 2, axis=-1, keepdims=True)  # biased var (PyTorch)
    return (x - mu) * jax.lax.rsqrt(var + LN_EPS) * w + b


def encoder_kernel(x_ref, bias_ref, hm_ref,
                   wqkv_ref, bqkv_ref, wo_ref, bo_ref, ln1w_ref, ln1b_ref,
                   w1_ref, b1_ref, w2_ref, b2_ref, ln2w_ref, ln2b_ref,
                   out_ref):
    x = x_ref[...]        # (B*S, D)   batch-flattened activation
    bias = bias_ref[...]  # (H*B*S, B*S) additive score bias (pad / cross-batch -> -1e10)
    hm = hm_ref[...]      # (H*B*S, D)   head-column mask (1 where column belongs to head)

    n_rows = x.shape[0]                    # B*S (static)
    scale = 1.0 / math.sqrt(D_KEY)

    # Static unroll over layers: all weights stay VMEM-resident; the activation
    # `x` never leaves vregs/VMEM between layers.
    for l in range(N_LAYERS):
        # ---- multi-head self-attention ----------------------------------
        # Fused QKV projection: one (BS, D) @ (D, 3D) matmul.
        qkv = jnp.dot(x, wqkv_ref[l], preferred_element_type=jnp.float32) + bqkv_ref[l]
        q = qkv[:, 0:D_MODEL]
        k = qkv[:, D_MODEL:2 * D_MODEL]
        v = qkv[:, 2 * D_MODEL:3 * D_MODEL]

        # Stack masked Q heads along sublanes (head-major, jnp.tile order):
        # (q * head_mask_h) @ k^T == Q_h @ K_h^T, so one matmul covers every
        # head and every batch row.  Cross-batch / padded keys get -1e10.
        qs = jnp.tile(q, (N_HEADS, 1)) * hm                          # (H*BS, D)
        s = jax.lax.dot_general(qs, k, (((1,), (1,)), ((), ())),
                                preferred_element_type=jnp.float32)  # (H*BS, BS)
        s = s * scale + bias
        s = s - jnp.max(s, axis=-1, keepdims=True)
        e = jnp.exp(s)
        # approx reciprocal -> EUP slot (tiny ~2^-12 relative deviation).
        p = e * pl.reciprocal(jnp.sum(e, axis=-1, keepdims=True), approx=True)

        av = jnp.dot(p, v, preferred_element_type=jnp.float32)       # (H*BS, D)
        avm = av * hm                                                # keep own head's cols
        a = avm[0:n_rows]
        for h in range(1, N_HEADS):                                  # sum == concat heads
            a = a + avm[h * n_rows:(h + 1) * n_rows]                 # (BS, D)

        attn = jnp.dot(a, wo_ref[l], preferred_element_type=jnp.float32) + bo_ref[l]
        x = _layer_norm(x + attn, ln1w_ref[l], ln1b_ref[l])

        # ---- position-wise FFN: w2(relu(w1(x))) --------------------------
        h1 = jnp.maximum(
            jnp.dot(x, w1_ref[l], preferred_element_type=jnp.float32) + b1_ref[l], 0.0)
        ffn = jnp.dot(h1, w2_ref[l], preferred_element_type=jnp.float32) + b2_ref[l]
        x = _layer_norm(x + ffn, ln2w_ref[l], ln2b_ref[l])

    out_ref[...] = x


def encoder_forward(src, src_mask, params):
    """src: (B, S, D) f32, src_mask: (B, 1, S) f32 (1 keep / 0 pad)."""
    B, S, D = src.shape
    assert D == D_MODEL
    BS = B * S
    x2d = src.reshape(BS, D).astype(jnp.float32)

    # Additive attention bias over the batch-flattened (H*BS, BS) score matrix.
    # Row r = h*BS + b*S + i (tile order); col c = b'*S + j.  A score is kept
    # only if b == b' and key j of batch b' is not padding; everything else
    # gets -1e10 (same constant as PyTorch masked_fill), which underflows to
    # exactly 0 probability after the max-subtracted exp.
    keep = src_mask.reshape(BS).astype(jnp.float32)            # (BS,)
    row_batch = (jnp.arange(N_HEADS * BS) // S) % B            # (H*BS,)
    col_batch = jnp.arange(BS) // S                            # (BS,)
    valid = (row_batch[:, None] == col_batch[None, :]) & (keep[None, :] > 0.5)
    bias = jnp.where(valid, 0.0, -1e10).astype(jnp.float32)    # (H*BS, BS)
    # NOTE: a fully-padded sequence would give a uniform softmax over B*S keys
    # (degenerate case, also degenerate in PyTorch); not exercised here.

    # Head-column mask (layer-invariant constant): column d belongs to head d//D_KEY.
    head_of_row = jnp.arange(N_HEADS * BS) // BS               # (H*BS,)
    col_head = jnp.arange(D_MODEL) // D_KEY                    # (D,)
    hm = (head_of_row[:, None] == col_head[None, :]).astype(jnp.float32)  # (H*BS, D)

    n_in = 3 + len(params)
    out2d = pl.pallas_call(
        encoder_kernel,
        out_shape=jax.ShapeDtypeStruct((BS, D_MODEL), jnp.float32),
        # Single invocation (no grid): everything fits VMEM with huge margin,
        # so keep it on one TensorCore (no megacore split of trivial work).
        in_specs=[pl.BlockSpec(memory_space=pltpu.MemorySpace.VMEM)] * n_in,
        out_specs=pl.BlockSpec(memory_space=pltpu.MemorySpace.VMEM),
    )(x2d, bias, hm, *params)
    return out2d.reshape(B, S, D)


def init_params(key):
    """Deterministic init mirroring nn.Linear / nn.LayerNorm shapes.

    Weights stored pre-transposed as (in_features, out_features); Q/K/V fused
    into (D, 3D); everything stacked over layers as (N_LAYERS, ...)."""
    def linear(k, fan_in, fan_out):
        k1, k2 = jax.random.split(k)
        bound = 1.0 / math.sqrt(fan_in)
        w = jax.random.uniform(k1, (fan_in, fan_out), jnp.float32, -bound, bound)
        b = jax.random.uniform(k2, (1, fan_out), jnp.float32, -bound, bound)
        return w, b

    per_tensor = [[] for _ in range(12)]
    for _ in range(N_LAYERS):
        key, kq, kk, kv, ko, k1, k2 = jax.random.split(key, 7)
        wq, bq = linear(kq, D_MODEL, D_MODEL)
        wk, bk = linear(kk, D_MODEL, D_MODEL)
        wv, bv = linear(kv, D_MODEL, D_MODEL)
        wo, bo = linear(ko, D_MODEL, D_MODEL)
        w1, b1 = linear(k1, D_MODEL, D_FFN)
        w2, b2 = linear(k2, D_FFN, D_MODEL)
        layer_vals = [
            jnp.concatenate([wq, wk, wv], axis=1),   # wqkv (D, 3D)
            jnp.concatenate([bq, bk, bv], axis=1),   # bqkv (1, 3D)
            wo, bo,
            jnp.ones((1, D_MODEL), jnp.float32), jnp.zeros((1, D_MODEL), jnp.float32),
            w1, b1, w2, b2,
            jnp.ones((1, D_MODEL), jnp.float32), jnp.zeros((1, D_MODEL), jnp.float32),
        ]
        for i, v in enumerate(layer_vals):
            per_tensor[i].append(v)
    # Order must match the kernel signature.
    return [jnp.stack(v, axis=0) for v in per_tensor]


if __name__ == "__main__":
    B, S = 2, 8
    key = jax.random.PRNGKey(0)
    k_src, k_par = jax.random.split(key)

    src = jax.random.normal(k_src, (B, S, D_MODEL), jnp.float32)

    # src_mask: sequence 0 fully valid, sequence 1 has 5 valid tokens then padding.
    lengths = jnp.array([S, 5])
    pos = jnp.arange(S)[None, :]
    src_mask = (pos < lengths[:, None]).astype(jnp.float32).reshape(B, 1, S)

    params = init_params(k_par)

    fwd = jax.jit(encoder_forward)
    out = fwd(src, src_mask, params)
    out = jax.block_until_ready(out)
    assert out.shape == (B, S, D_MODEL)
    assert bool(jnp.all(jnp.isfinite(out)))
    print("KERNEL_OK")
</pallas_src>

<mosaic_0001>
module attributes {stable_mosaic.version = 11 : i64} {
  func.func @encoder_kernel(%arg0: memref<16x8xf32, #tpu.memory_space<vmem>>, %arg1: memref<64x16xf32, #tpu.memory_space<vmem>>, %arg2: memref<64x8xf32, #tpu.memory_space<vmem>>, %arg3: memref<4x8x24xf32, #tpu.memory_space<vmem>>, %arg4: memref<4x1x24xf32, #tpu.memory_space<vmem>>, %arg5: memref<4x8x8xf32, #tpu.memory_space<vmem>>, %arg6: memref<4x1x8xf32, #tpu.memory_space<vmem>>, %arg7: memref<4x1x8xf32, #tpu.memory_space<vmem>>, %arg8: memref<4x1x8xf32, #tpu.memory_space<vmem>>, %arg9: memref<4x8x32xf32, #tpu.memory_space<vmem>>, %arg10: memref<4x1x32xf32, #tpu.memory_space<vmem>>, %arg11: memref<4x32x8xf32, #tpu.memory_space<vmem>>, %arg12: memref<4x1x8xf32, #tpu.memory_space<vmem>>, %arg13: memref<4x1x8xf32, #tpu.memory_space<vmem>>, %arg14: memref<4x1x8xf32, #tpu.memory_space<vmem>>, %arg15: memref<16x8xf32, #tpu.memory_space<vmem>>) attributes {dimension_semantics = [], scalar_prefetch = 0 : i64, scratch_operands = 0 : i64, tpu.core_type = #tpu.core_type<tc>} {
    %c0 = arith.constant 0 : index
    %c0_0 = arith.constant 0 : index
    %0 = vector.load %arg0[%c0, %c0_0] : memref<16x8xf32, #tpu.memory_space<vmem>>, vector<16x8xf32>
    %c0_1 = arith.constant 0 : index
    %c0_2 = arith.constant 0 : index
    %1 = vector.load %arg1[%c0_1, %c0_2] : memref<64x16xf32, #tpu.memory_space<vmem>>, vector<64x16xf32>
    %c0_3 = arith.constant 0 : index
    %c0_4 = arith.constant 0 : index
    %2 = vector.load %arg2[%c0_3, %c0_4] : memref<64x8xf32, #tpu.memory_space<vmem>>, vector<64x8xf32>
    %c0_5 = arith.constant 0 : index
    %c0_6 = arith.constant 0 : index
    %c0_7 = arith.constant 0 : index
    %3 = vector.load %arg3[%c0_5, %c0_6, %c0_7] : memref<4x8x24xf32, #tpu.memory_space<vmem>>, vector<1x8x24xf32>
    %4 = vector.shape_cast %3 : vector<1x8x24xf32> to vector<8x24xf32>
    %cst = arith.constant dense<0.000000e+00> : vector<16x24xf32>
    %5 = tpu.matmul %0, %4, %cst {dimension_numbers = #tpu.dot_dimension_numbers<[1], [0], [0], [1], [0, 0, 1, 1], [], []>} : vector<16x8xf32>, vector<8x24xf32>, vector<16x24xf32> -> vector<16x24xf32>
    %c0_8 = arith.constant 0 : index
    %c0_9 = arith.constant 0 : index
    %c0_10 = arith.constant 0 : index
    %6 = vector.load %arg4[%c0_8, %c0_9, %c0_10] : memref<4x1x24xf32, #tpu.memory_space<vmem>>, vector<1x1x24xf32>
    %7 = vector.shape_cast %6 : vector<1x1x24xf32> to vector<1x24xf32>
    %8 = vector.broadcast %7 : vector<1x24xf32> to vector<16x24xf32>
    %9 = arith.addf %5, %8 : vector<16x24xf32>
    %10 = vector.extract_strided_slice %9 {offsets = [0, 0], sizes = [16, 8], strides = [1, 1]} : vector<16x24xf32> to vector<16x8xf32>
    %11 = vector.extract_strided_slice %9 {offsets = [0, 8], sizes = [16, 8], strides = [1, 1]} : vector<16x24xf32> to vector<16x8xf32>
    %12 = vector.extract_strided_slice %9 {offsets = [0, 16], sizes = [16, 8], strides = [1, 1]} : vector<16x24xf32> to vector<16x8xf32>
    %13 = tpu.concatenate %10, %10, %10, %10 in 0 : vector<16x8xf32>, vector<16x8xf32>, vector<16x8xf32>, vector<16x8xf32> -> vector<64x8xf32>
    %14 = arith.mulf %13, %2 : vector<64x8xf32>
    %cst_11 = arith.constant dense<0.000000e+00> : vector<64x16xf32>
    %15 = tpu.matmul %14, %11, %cst_11 {dimension_numbers = #tpu.dot_dimension_numbers<[1], [1], [0], [0], [0, 0, 1, 0], [], []>} : vector<64x8xf32>, vector<16x8xf32>, vector<64x16xf32> -> vector<64x16xf32>
    %cst_12 = arith.constant 0.707106769 : f32
    %16 = vector.broadcast %cst_12 : f32 to vector<64x16xf32>
    %17 = arith.mulf %15, %16 : vector<64x16xf32>
    %18 = arith.addf %17, %1 : vector<64x16xf32>
    %cst_13 = arith.constant dense<0xFF800000> : vector<64xf32>
    %19 = vector.multi_reduction <maximumf>, %18, %cst_13 [1] : vector<64x16xf32> to vector<64xf32>
    %20 = vector.shape_cast %19 : vector<64xf32> to vector<64x1xf32>
    %21 = vector.broadcast %20 : vector<64x1xf32> to vector<64x16xf32>
    %22 = arith.subf %18, %21 : vector<64x16xf32>
    %23 = math.exp %22 : vector<64x16xf32>
    %cst_14 = arith.constant dense<0.000000e+00> : vector<64xf32>
    %24 = vector.multi_reduction <add>, %23, %cst_14 [1] : vector<64x16xf32> to vector<64xf32>
    %25 = vector.shape_cast %24 : vector<64xf32> to vector<64x1xf32>
    %26 = tpu.reciprocal %25 {approx = true} : vector<64x1xf32> -> vector<64x1xf32>
    %27 = vector.broadcast %26 : vector<64x1xf32> to vector<64x16xf32>
    %28 = arith.mulf %23, %27 : vector<64x16xf32>
    %cst_15 = arith.constant dense<0.000000e+00> : vector<64x8xf32>
    %29 = tpu.matmul %28, %12, %cst_15 {dimension_numbers = #tpu.dot_dimension_numbers<[1], [0], [0], [1], [0, 0, 1, 1], [], []>} : vector<64x16xf32>, vector<16x8xf32>, vector<64x8xf32> -> vector<64x8xf32>
    %30 = arith.mulf %29, %2 : vector<64x8xf32>
    %31 = vector.extract_strided_slice %30 {offsets = [0, 0], sizes = [16, 8], strides = [1, 1]} : vector<64x8xf32> to vector<16x8xf32>
    %32 = vector.extract_strided_slice %30 {offsets = [16, 0], sizes = [16, 8], strides = [1, 1]} : vector<64x8xf32> to vector<16x8xf32>
    %33 = arith.addf %31, %32 : vector<16x8xf32>
    %34 = vector.extract_strided_slice %30 {offsets = [32, 0], sizes = [16, 8], strides = [1, 1]} : vector<64x8xf32> to vector<16x8xf32>
    %35 = arith.addf %33, %34 : vector<16x8xf32>
    %36 = vector.extract_strided_slice %30 {offsets = [48, 0], sizes = [16, 8], strides = [1, 1]} : vector<64x8xf32> to vector<16x8xf32>
    %37 = arith.addf %35, %36 : vector<16x8xf32>
    %c0_16 = arith.constant 0 : index
    %c0_17 = arith.constant 0 : index
    %c0_18 = arith.constant 0 : index
    %38 = vector.load %arg5[%c0_16, %c0_17, %c0_18] : memref<4x8x8xf32, #tpu.memory_space<vmem>>, vector<1x8x8xf32>
    %39 = vector.shape_cast %38 : vector<1x8x8xf32> to vector<8x8xf32>
    %cst_19 = arith.constant dense<0.000000e+00> : vector<16x8xf32>
    %40 = tpu.matmul %37, %39, %cst_19 {dimension_numbers = #tpu.dot_dimension_numbers<[1], [0], [0], [1], [0, 0, 1, 1], [], []>} : vector<16x8xf32>, vector<8x8xf32>, vector<16x8xf32> -> vector<16x8xf32>
    %c0_20 = arith.constant 0 : index
    %c0_21 = arith.constant 0 : index
    %c0_22 = arith.constant 0 : index
    %41 = vector.load %arg6[%c0_20, %c0_21, %c0_22] : memref<4x1x8xf32, #tpu.memory_space<vmem>>, vector<1x1x8xf32>
    %42 = vector.shape_cast %41 : vector<1x1x8xf32> to vector<1x8xf32>
    %43 = vector.broadcast %42 : vector<1x8xf32> to vector<16x8xf32>
    %44 = arith.addf %40, %43 : vector<16x8xf32>
    %45 = arith.addf %0, %44 : vector<16x8xf32>
    %c0_23 = arith.constant 0 : index
    %c0_24 = arith.constant 0 : index
    %c0_25 = arith.constant 0 : index
    %46 = vector.load %arg7[%c0_23, %c0_24, %c0_25] : memref<4x1x8xf32, #tpu.memory_space<vmem>>, vector<1x1x8xf32>
    %47 = vector.shape_cast %46 : vector<1x1x8xf32> to vector<1x8xf32>
    %c0_26 = arith.constant 0 : index
    %c0_27 = arith.constant 0 : index
    %c0_28 = arith.constant 0 : index
    %48 = vector.load %arg8[%c0_26, %c0_27, %c0_28] : memref<4x1x8xf32, #tpu.memory_space<vmem>>, vector<1x1x8xf32>
    %49 = vector.shape_cast %48 : vector<1x1x8xf32> to vector<1x8xf32>
    %cst_29 = arith.constant dense<0.000000e+00> : vector<16xf32>
    %50 = vector.multi_reduction <add>, %45, %cst_29 [1] : vector<16x8xf32> to vector<16xf32>
    %51 = vector.shape_cast %50 : vector<16xf32> to vector<16x1xf32>
    %cst_30 = arith.constant 8.000000e+00 : f32
    %52 = vector.broadcast %cst_30 : f32 to vector<16x1xf32>
    %53 = arith.divf %51, %52 : vector<16x1xf32>
    %54 = vector.broadcast %53 : vector<16x1xf32> to vector<16x8xf32>
    %55 = arith.subf %45, %54 : vector<16x8xf32>
    %56 = arith.mulf %55, %55 : vector<16x8xf32>
    %cst_31 = arith.constant dense<0.000000e+00> : vector<16xf32>
    %57 = vector.multi_reduction <add>, %56, %cst_31 [1] : vector<16x8xf32> to vector<16xf32>
    %58 = vector.shape_cast %57 : vector<16xf32> to vector<16x1xf32>
    %cst_32 = arith.constant 8.000000e+00 : f32
    %59 = vector.broadcast %cst_32 : f32 to vector<16x1xf32>
    %60 = arith.divf %58, %59 : vector<16x1xf32>
    %61 = vector.broadcast %53 : vector<16x1xf32> to vector<16x8xf32>
    %62 = arith.subf %45, %61 : vector<16x8xf32>
    %cst_33 = arith.constant 9.99999974E-6 : f32
    %63 = vector.broadcast %cst_33 : f32 to vector<16x1xf32>
    %64 = arith.addf %60, %63 : vector<16x1xf32>
    %65 = math.rsqrt %64 : vector<16x1xf32>
    %66 = vector.broadcast %65 : vector<16x1xf32> to vector<16x8xf32>
    %67 = arith.mulf %62, %66 : vector<16x8xf32>
    %68 = vector.broadcast %47 : vector<1x8xf32> to vector<16x8xf32>
    %69 = arith.mulf %67, %68 : vector<16x8xf32>
    %70 = vector.broadcast %49 : vector<1x8xf32> to vector<16x8xf32>
    %71 = arith.addf %69, %70 : vector<16x8xf32>
    %c0_34 = arith.constant 0 : index
    %c0_35 = arith.constant 0 : index
    %c0_36 = arith.constant 0 : index
    %72 = vector.load %arg9[%c0_34, %c0_35, %c0_36] : memref<4x8x32xf32, #tpu.memory_space<vmem>>, vector<1x8x32xf32>
    %73 = vector.shape_cast %72 : vector<1x8x32xf32> to vector<8x32xf32>
    %cst_37 = arith.constant dense<0.000000e+00> : vector<16x32xf32>
    %74 = tpu.matmul %71, %73, %cst_37 {dimension_numbers = #tpu.dot_dimension_numbers<[1], [0], [0], [1], [0, 0, 1, 1], [], []>} : vector<16x8xf32>, vector<8x32xf32>, vector<16x32xf32> -> vector<16x32xf32>
    %c0_38 = arith.constant 0 : index
    %c0_39 = arith.constant 0 : index
    %c0_40 = arith.constant 0 : index
    %75 = vector.load %arg10[%c0_38, %c0_39, %c0_40] : memref<4x1x32xf32, #tpu.memory_space<vmem>>, vector<1x1x32xf32>
    %76 = vector.shape_cast %75 : vector<1x1x32xf32> to vector<1x32xf32>
    %77 = vector.broadcast %76 : vector<1x32xf32> to vector<16x32xf32>
    %78 = arith.addf %74, %77 : vector<16x32xf32>
    %cst_41 = arith.constant 0.000000e+00 : f32
    %79 = vector.broadcast %cst_41 : f32 to vector<16x32xf32>
    %80 = arith.maximumf %78, %79 : vector<16x32xf32>
    %c0_42 = arith.constant 0 : index
    %c0_43 = arith.constant 0 : index
    %c0_44 = arith.constant 0 : index
    %81 = vector.load %arg11[%c0_42, %c0_43, %c0_44] : memref<4x32x8xf32, #tpu.memory_space<vmem>>, vector<1x32x8xf32>
    %82 = vector.shape_cast %81 : vector<1x32x8xf32> to vector<32x8xf32>
    %cst_45 = arith.constant dense<0.000000e+00> : vector<16x8xf32>
    %83 = tpu.matmul %80, %82, %cst_45 {dimension_numbers = #tpu.dot_dimension_numbers<[1], [0], [0], [1], [0, 0, 1, 1], [], []>} : vector<16x32xf32>, vector<32x8xf32>, vector<16x8xf32> -> vector<16x8xf32>
    %c0_46 = arith.constant 0 : index
    %c0_47 = arith.constant 0 : index
    %c0_48 = arith.constant 0 : index
    %84 = vector.load %arg12[%c0_46, %c0_47, %c0_48] : memref<4x1x8xf32, #tpu.memory_space<vmem>>, vector<1x1x8xf32>
    %85 = vector.shape_cast %84 : vector<1x1x8xf32> to vector<1x8xf32>
    %86 = vector.broadcast %85 : vector<1x8xf32> to vector<16x8xf32>
    %87 = arith.addf %83, %86 : vector<16x8xf32>
    %88 = arith.addf %71, %87 : vector<16x8xf32>
    %c0_49 = arith.constant 0 : index
    %c0_50 = arith.constant 0 : index
    %c0_51 = arith.constant 0 : index
    %89 = vector.load %arg13[%c0_49, %c0_50, %c0_51] : memref<4x1x8xf32, #tpu.memory_space<vmem>>, vector<1x1x8xf32>
    %90 = vector.shape_cast %89 : vector<1x1x8xf32> to vector<1x8xf32>
    %c0_52 = arith.constant 0 : index
    %c0_53 = arith.constant 0 : index
    %c0_54 = arith.constant 0 : index
    %91 = vector.load %arg14[%c0_52, %c0_53, %c0_54] : memref<4x1x8xf32, #tpu.memory_space<vmem>>, vector<1x1x8xf32>
    %92 = vector.shape_cast %91 : vector<1x1x8xf32> to vector<1x8xf32>
    %cst_55 = arith.constant dense<0.000000e+00> : vector<16xf32>
    %93 = vector.multi_reduction <add>, %88, %cst_55 [1] : vector<16x8xf32> to vector<16xf32>
    %94 = vector.shape_cast %93 : vector<16xf32> to vector<16x1xf32>
    %cst_56 = arith.constant 8.000000e+00 : f32
    %95 = vector.broadcast %cst_56 : f32 to vector<16x1xf32>
    %96 = arith.divf %94, %95 : vector<16x1xf32>
    %97 = vector.broadcast %96 : vector<16x1xf32> to vector<16x8xf32>
    %98 = arith.subf %88, %97 : vector<16x8xf32>
    %99 = arith.mulf %98, %98 : vector<16x8xf32>
    %cst_57 = arith.constant dense<0.000000e+00> : vector<16xf32>
    %100 = vector.multi_reduction <add>, %99, %cst_57 [1] : vector<16x8xf32> to vector<16xf32>
    %101 = vector.shape_cast %100 : vector<16xf32> to vector<16x1xf32>
    %cst_58 = arith.constant 8.000000e+00 : f32
    %102 = vector.broadcast %cst_58 : f32 to vector<16x1xf32>
    %103 = arith.divf %101, %102 : vector<16x1xf32>
    %104 = vector.broadcast %96 : vector<16x1xf32> to vector<16x8xf32>
    %105 = arith.subf %88, %104 : vector<16x8xf32>
    %cst_59 = arith.constant 9.99999974E-6 : f32
    %106 = vector.broadcast %cst_59 : f32 to vector<16x1xf32>
    %107 = arith.addf %103, %106 : vector<16x1xf32>
    %108 = math.rsqrt %107 : vector<16x1xf32>
    %109 = vector.broadcast %108 : vector<16x1xf32> to vector<16x8xf32>
    %110 = arith.mulf %105, %109 : vector<16x8xf32>
    %111 = vector.broadcast %90 : vector<1x8xf32> to vector<16x8xf32>
    %112 = arith.mulf %110, %111 : vector<16x8xf32>
    %113 = vector.broadcast %92 : vector<1x8xf32> to vector<16x8xf32>
    %114 = arith.addf %112, %113 : vector<16x8xf32>
    %c1 = arith.constant 1 : index
    %c0_60 = arith.constant 0 : index
    %c0_61 = arith.constant 0 : index
    %115 = vector.load %arg3[%c1, %c0_60, %c0_61] : memref<4x8x24xf32, #tpu.memory_space<vmem>>, vector<1x8x24xf32>
    %116 = vector.shape_cast %115 : vector<1x8x24xf32> to vector<8x24xf32>
    %cst_62 = arith.constant dense<0.000000e+00> : vector<16x24xf32>
    %117 = tpu.matmul %114, %116, %cst_62 {dimension_numbers = #tpu.dot_dimension_numbers<[1], [0], [0], [1], [0, 0, 1, 1], [], []>} : vector<16x8xf32>, vector<8x24xf32>, vector<16x24xf32> -> vector<16x24xf32>
    %c1_63 = arith.constant 1 : index
    %c0_64 = arith.constant 0 : index
    %c0_65 = arith.constant 0 : index
    %118 = vector.load %arg4[%c1_63, %c0_64, %c0_65] : memref<4x1x24xf32, #tpu.memory_space<vmem>>, vector<1x1x24xf32>
    %119 = vector.shape_cast %118 : vector<1x1x24xf32> to vector<1x24xf32>
    %120 = vector.broadcast %119 : vector<1x24xf32> to vector<16x24xf32>
    %121 = arith.addf %117, %120 : vector<16x24xf32>
    %122 = vector.extract_strided_slice %121 {offsets = [0, 0], sizes = [16, 8], strides = [1, 1]} : vector<16x24xf32> to vector<16x8xf32>
    %123 = vector.extract_strided_slice %121 {offsets = [0, 8], sizes = [16, 8], strides = [1, 1]} : vector<16x24xf32> to vector<16x8xf32>
    %124 = vector.extract_strided_slice %121 {offsets = [0, 16], sizes = [16, 8], strides = [1, 1]} : vector<16x24xf32> to vector<16x8xf32>
    %125 = tpu.concatenate %122, %122, %122, %122 in 0 : vector<16x8xf32>, vector<16x8xf32>, vector<16x8xf32>, vector<16x8xf32> -> vector<64x8xf32>
    %126 = arith.mulf %125, %2 : vector<64x8xf32>
    %cst_66 = arith.constant dense<0.000000e+00> : vector<64x16xf32>
    %127 = tpu.matmul %126, %123, %cst_66 {dimension_numbers = #tpu.dot_dimension_numbers<[1], [1], [0], [0], [0, 0, 1, 0], [], []>} : vector<64x8xf32>, vector<16x8xf32>, vector<64x16xf32> -> vector<64x16xf32>
    %cst_67 = arith.constant 0.707106769 : f32
    %128 = vector.broadcast %cst_67 : f32 to vector<64x16xf32>
    %129 = arith.mulf %127, %128 : vector<64x16xf32>
    %130 = arith.addf %129, %1 : vector<64x16xf32>
    %cst_68 = arith.constant dense<0xFF800000> : vector<64xf32>
    %131 = vector.multi_reduction <maximumf>, %130, %cst_68 [1] : vector<64x16xf32> to vector<64xf32>
    %132 = vector.shape_cast %131 : vector<64xf32> to vector<64x1xf32>
    %133 = vector.broadcast %132 : vector<64x1xf32> to vector<64x16xf32>
    %134 = arith.subf %130, %133 : vector<64x16xf32>
    %135 = math.exp %134 : vector<64x16xf32>
    %cst_69 = arith.constant dense<0.000000e+00> : vector<64xf32>
    %136 = vector.multi_reduction <add>, %135, %cst_69 [1] : vector<64x16xf32> to vector<64xf32>
    %137 = vector.shape_cast %136 : vector<64xf32> to vector<64x1xf32>
    %138 = tpu.reciprocal %137 {approx = true} : vector<64x1xf32> -> vector<64x1xf32>
    %139 = vector.broadcast %138 : vector<64x1xf32> to vector<64x16xf32>
    %140 = arith.mulf %135, %139 : vector<64x16xf32>
    %cst_70 = arith.constant dense<0.000000e+00> : vector<64x8xf32>
    %141 = tpu.matmul %140, %124, %cst_70 {dimension_numbers = #tpu.dot_dimension_numbers<[1], [0], [0], [1], [0, 0, 1, 1], [], []>} : vector<64x16xf32>, vector<16x8xf32>, vector<64x8xf32> -> vector<64x8xf32>
    %142 = arith.mulf %141, %2 : vector<64x8xf32>
    %143 = vector.extract_strided_slice %142 {offsets = [0, 0], sizes = [16, 8], strides = [1, 1]} : vector<64x8xf32> to vector<16x8xf32>
    %144 = vector.extract_strided_slice %142 {offsets = [16, 0], sizes = [16, 8], strides = [1, 1]} : vector<64x8xf32> to vector<16x8xf32>
    %145 = arith.addf %143, %144 : vector<16x8xf32>
    %146 = vector.extract_strided_slice %142 {offsets = [32, 0], sizes = [16, 8], strides = [1, 1]} : vector<64x8xf32> to vector<16x8xf32>
    %147 = arith.addf %145, %146 : vector<16x8xf32>
    %148 = vector.extract_strided_slice %142 {offsets = [48, 0], sizes = [16, 8], strides = [1, 1]} : vector<64x8xf32> to vector<16x8xf32>
    %149 = arith.addf %147, %148 : vector<16x8xf32>
    %c1_71 = arith.constant 1 : index
    %c0_72 = arith.constant 0 : index
    %c0_73 = arith.constant 0 : index
    %150 = vector.load %arg5[%c1_71, %c0_72, %c0_73] : memref<4x8x8xf32, #tpu.memory_space<vmem>>, vector<1x8x8xf32>
    %151 = vector.shape_cast %150 : vector<1x8x8xf32> to vector<8x8xf32>
    %cst_74 = arith.constant dense<0.000000e+00> : vector<16x8xf32>
    %152 = tpu.matmul %149, %151, %cst_74 {dimension_numbers = #tpu.dot_dimension_numbers<[1], [0], [0], [1], [0, 0, 1, 1], [], []>} : vector<16x8xf32>, vector<8x8xf32>, vector<16x8xf32> -> vector<16x8xf32>
    %c1_75 = arith.constant 1 : index
    %c0_76 = arith.constant 0 : index
    %c0_77 = arith.constant 0 : index
    %153 = vector.load %arg6[%c1_75, %c0_76, %c0_77] : memref<4x1x8xf32, #tpu.memory_space<vmem>>, vector<1x1x8xf32>
    %154 = vector.shape_cast %153 : vector<1x1x8xf32> to vector<1x8xf32>
    %155 = vector.broadcast %154 : vector<1x8xf32> to vector<16x8xf32>
    %156 = arith.addf %152, %155 : vector<16x8xf32>
    %157 = arith.addf %114, %156 : vector<16x8xf32>
    %c1_78 = arith.constant 1 : index
    %c0_79 = arith.constant 0 : index
    %c0_80 = arith.constant 0 : index
    %158 = vector.load %arg7[%c1_78, %c0_79, %c0_80] : memref<4x1x8xf32, #tpu.memory_space<vmem>>, vector<1x1x8xf32>
    %159 = vector.shape_cast %158 : vector<1x1x8xf32> to vector<1x8xf32>
    %c1_81 = arith.constant 1 : index
    %c0_82 = arith.constant 0 : index
    %c0_83 = arith.constant 0 : index
    %160 = vector.load %arg8[%c1_81, %c0_82, %c0_83] : memref<4x1x8xf32, #tpu.memory_space<vmem>>, vector<1x1x8xf32>
    %161 = vector.shape_cast %160 : vector<1x1x8xf32> to vector<1x8xf32>
    %cst_84 = arith.constant dense<0.000000e+00> : vector<16xf32>
    %162 = vector.multi_reduction <add>, %157, %cst_84 [1] : vector<16x8xf32> to vector<16xf32>
    %163 = vector.shape_cast %162 : vector<16xf32> to vector<16x1xf32>
    %cst_85 = arith.constant 8.000000e+00 : f32
    %164 = vector.broadcast %cst_85 : f32 to vector<16x1xf32>
    %165 = arith.divf %163, %164 : vector<16x1xf32>
    %166 = vector.broadcast %165 : vector<16x1xf32> to vector<16x8xf32>
    %167 = arith.subf %157, %166 : vector<16x8xf32>
    %168 = arith.mulf %167, %167 : vector<16x8xf32>
    %cst_86 = arith.constant dense<0.000000e+00> : vector<16xf32>
    %169 = vector.multi_reduction <add>, %168, %cst_86 [1] : vector<16x8xf32> to vector<16xf32>
    %170 = vector.shape_cast %169 : vector<16xf32> to vector<16x1xf32>
    %cst_87 = arith.constant 8.000000e+00 : f32
    %171 = vector.broadcast %cst_87 : f32 to vector<16x1xf32>
    %172 = arith.divf %170, %171 : vector<16x1xf32>
    %173 = vector.broadcast %165 : vector<16x1xf32> to vector<16x8xf32>
    %174 = arith.subf %157, %173 : vector<16x8xf32>
    %cst_88 = arith.constant 9.99999974E-6 : f32
    %175 = vector.broadcast %cst_88 : f32 to vector<16x1xf32>
    %176 = arith.addf %172, %175 : vector<16x1xf32>
    %177 = math.rsqrt %176 : vector<16x1xf32>
    %178 = vector.broadcast %177 : vector<16x1xf32> to vector<16x8xf32>
    %179 = arith.mulf %174, %178 : vector<16x8xf32>
    %180 = vector.broadcast %159 : vector<1x8xf32> to vector<16x8xf32>
    %181 = arith.mulf %179, %180 : vector<16x8xf32>
    %182 = vector.broadcast %161 : vector<1x8xf32> to vector<16x8xf32>
    %183 = arith.addf %181, %182 : vector<16x8xf32>
    %c1_89 = arith.constant 1 : index
    %c0_90 = arith.constant 0 : index
    %c0_91 = arith.constant 0 : index
    %184 = vector.load %arg9[%c1_89, %c0_90, %c0_91] : memref<4x8x32xf32, #tpu.memory_space<vmem>>, vector<1x8x32xf32>
    %185 = vector.shape_cast %184 : vector<1x8x32xf32> to vector<8x32xf32>
    %cst_92 = arith.constant dense<0.000000e+00> : vector<16x32xf32>
    %186 = tpu.matmul %183, %185, %cst_92 {dimension_numbers = #tpu.dot_dimension_numbers<[1], [0], [0], [1], [0, 0, 1, 1], [], []>} : vector<16x8xf32>, vector<8x32xf32>, vector<16x32xf32> -> vector<16x32xf32>
    %c1_93 = arith.constant 1 : index
    %c0_94 = arith.constant 0 : index
    %c0_95 = arith.constant 0 : index
    %187 = vector.load %arg10[%c1_93, %c0_94, %c0_95] : memref<4x1x32xf32, #tpu.memory_space<vmem>>, vector<1x1x32xf32>
    %188 = vector.shape_cast %187 : vector<1x1x32xf32> to vector<1x32xf32>
    %189 = vector.broadcast %188 : vector<1x32xf32> to vector<16x32xf32>
    %190 = arith.addf %186, %189 : vector<16x32xf32>
    %cst_96 = arith.constant 0.000000e+00 : f32
    %191 = vector.broadcast %cst_96 : f32 to vector<16x32xf32>
    %192 = arith.maximumf %190, %191 : vector<16x32xf32>
    %c1_97 = arith.constant 1 : index
    %c0_98 = arith.constant 0 : index
    %c0_99 = arith.constant 0 : index
    %193 = vector.load %arg11[%c1_97, %c0_98, %c0_99] : memref<4x32x8xf32, #tpu.memory_space<vmem>>, vector<1x32x8xf32>
    %194 = vector.shape_cast %193 : vector<1x32x8xf32> to vector<32x8xf32>
    %cst_100 = arith.constant dense<0.000000e+00> : vector<16x8xf32>
    %195 = tpu.matmul %192, %194, %cst_100 {dimension_numbers = #tpu.dot_dimension_numbers<[1], [0], [0], [1], [0, 0, 1, 1], [], []>} : vector<16x32xf32>, vector<32x8xf32>, vector<16x8xf32> -> vector<16x8xf32>
    %c1_101 = arith.constant 1 : index
    %c0_102 = arith.constant 0 : index
    %c0_103 = arith.constant 0 : index
    %196 = vector.load %arg12[%c1_101, %c0_102, %c0_103] : memref<4x1x8xf32, #tpu.memory_space<vmem>>, vector<1x1x8xf32>
    %197 = vector.shape_cast %196 : vector<1x1x8xf32> to vector<1x8xf32>
    %198 = vector.broadcast %197 : vector<1x8xf32> to vector<16x8xf32>
    %199 = arith.addf %195, %198 : vector<16x8xf32>
    %200 = arith.addf %183, %199 : vector<16x8xf32>
    %c1_104 = arith.constant 1 : index
    %c0_105 = arith.constant 0 : index
    %c0_106 = arith.constant 0 : index
    %201 = vector.load %arg13[%c1_104, %c0_105, %c0_106] : memref<4x1x8xf32, #tpu.memory_space<vmem>>, vector<1x1x8xf32>
    %202 = vector.shape_cast %201 : vector<1x1x8xf32> to vector<1x8xf32>
    %c1_107 = arith.constant 1 : index
    %c0_108 = arith.constant 0 : index
    %c0_109 = arith.constant 0 : index
    %203 = vector.load %arg14[%c1_107, %c0_108, %c0_109] : memref<4x1x8xf32, #tpu.memory_space<vmem>>, vector<1x1x8xf32>
    %204 = vector.shape_cast %203 : vector<1x1x8xf32> to vector<1x8xf32>
    %cst_110 = arith.constant dense<0.000000e+00> : vector<16xf32>
    %205 = vector.multi_reduction <add>, %200, %cst_110 [1] : vector<16x8xf32> to vector<16xf32>
    %206 = vector.shape_cast %205 : vector<16xf32> to vector<16x1xf32>
    %cst_111 = arith.constant 8.000000e+00 : f32
    %207 = vector.broadcast %cst_111 : f32 to vector<16x1xf32>
    %208 = arith.divf %206, %207 : vector<16x1xf32>
    %209 = vector.broadcast %208 : vector<16x1xf32> to vector<16x8xf32>
    %210 = arith.subf %200, %209 : vector<16x8xf32>
    %211 = arith.mulf %210, %210 : vector<16x8xf32>
    %cst_112 = arith.constant dense<0.000000e+00> : vector<16xf32>
    %212 = vector.multi_reduction <add>, %211, %cst_112 [1] : vector<16x8xf32> to vector<16xf32>
    %213 = vector.shape_cast %212 : vector<16xf32> to vector<16x1xf32>
    %cst_113 = arith.constant 8.000000e+00 : f32
    %214 = vector.broadcast %cst_113 : f32 to vector<16x1xf32>
    %215 = arith.divf %213, %214 : vector<16x1xf32>
    %216 = vector.broadcast %208 : vector<16x1xf32> to vector<16x8xf32>
    %217 = arith.subf %200, %216 : vector<16x8xf32>
    %cst_114 = arith.constant 9.99999974E-6 : f32
    %218 = vector.broadcast %cst_114 : f32 to vector<16x1xf32>
    %219 = arith.addf %215, %218 : vector<16x1xf32>
    %220 = math.rsqrt %219 : vector<16x1xf32>
    %221 = vector.broadcast %220 : vector<16x1xf32> to vector<16x8xf32>
    %222 = arith.mulf %217, %221 : vector<16x8xf32>
    %223 = vector.broadcast %202 : vector<1x8xf32> to vector<16x8xf32>
    %224 = arith.mulf %222, %223 : vector<16x8xf32>
    %225 = vector.broadcast %204 : vector<1x8xf32> to vector<16x8xf32>
    %226 = arith.addf %224, %225 : vector<16x8xf32>
    %c2 = arith.constant 2 : index
    %c0_115 = arith.constant 0 : index
    %c0_116 = arith.constant 0 : index
    %227 = vector.load %arg3[%c2, %c0_115, %c0_116] : memref<4x8x24xf32, #tpu.memory_space<vmem>>, vector<1x8x24xf32>
    %228 = vector.shape_cast %227 : vector<1x8x24xf32> to vector<8x24xf32>
    %cst_117 = arith.constant dense<0.000000e+00> : vector<16x24xf32>
    %229 = tpu.matmul %226, %228, %cst_117 {dimension_numbers = #tpu.dot_dimension_numbers<[1], [0], [0], [1], [0, 0, 1, 1], [], []>} : vector<16x8xf32>, vector<8x24xf32>, vector<16x24xf32> -> vector<16x24xf32>
    %c2_118 = arith.constant 2 : index
    %c0_119 = arith.constant 0 : index
    %c0_120 = arith.constant 0 : index
    %230 = vector.load %arg4[%c2_118, %c0_119, %c0_120] : memref<4x1x24xf32, #tpu.memory_space<vmem>>, vector<1x1x24xf32>
    %231 = vector.shape_cast %230 : vector<1x1x24xf32> to vector<1x24xf32>
    %232 = vector.broadcast %231 : vector<1x24xf32> to vector<16x24xf32>
    %233 = arith.addf %229, %232 : vector<16x24xf32>
    %234 = vector.extract_strided_slice %233 {offsets = [0, 0], sizes = [16, 8], strides = [1, 1]} : vector<16x24xf32> to vector<16x8xf32>
    %235 = vector.extract_strided_slice %233 {offsets = [0, 8], sizes = [16, 8], strides = [1, 1]} : vector<16x24xf32> to vector<16x8xf32>
    %236 = vector.extract_strided_slice %233 {offsets = [0, 16], sizes = [16, 8], strides = [1, 1]} : vector<16x24xf32> to vector<16x8xf32>
    %237 = tpu.concatenate %234, %234, %234, %234 in 0 : vector<16x8xf32>, vector<16x8xf32>, vector<16x8xf32>, vector<16x8xf32> -> vector<64x8xf32>
    %238 = arith.mulf %237, %2 : vector<64x8xf32>
    %cst_121 = arith.constant dense<0.000000e+00> : vector<64x16xf32>
    %239 = tpu.matmul %238, %235, %cst_121 {dimension_numbers = #tpu.dot_dimension_numbers<[1], [1], [0], [0], [0, 0, 1, 0], [], []>} : vector<64x8xf32>, vector<16x8xf32>, vector<64x16xf32> -> vector<64x16xf32>
    %cst_122 = arith.constant 0.707106769 : f32
    %240 = vector.broadcast %cst_122 : f32 to vector<64x16xf32>
    %241 = arith.mulf %239, %240 : vector<64x16xf32>
    %242 = arith.addf %241, %1 : vector<64x16xf32>
    %cst_123 = arith.constant dense<0xFF800000> : vector<64xf32>
    %243 = vector.multi_reduction <maximumf>, %242, %cst_123 [1] : vector<64x16xf32> to vector<64xf32>
    %244 = vector.shape_cast %243 : vector<64xf32> to vector<64x1xf32>
    %245 = vector.broadcast %244 : vector<64x1xf32> to vector<64x16xf32>
    %246 = arith.subf %242, %245 : vector<64x16xf32>
    %247 = math.exp %246 : vector<64x16xf32>
    %cst_124 = arith.constant dense<0.000000e+00> : vector<64xf32>
    %248 = vector.multi_reduction <add>, %247, %cst_124 [1] : vector<64x16xf32> to vector<64xf32>
    %249 = vector.shape_cast %248 : vector<64xf32> to vector<64x1xf32>
    %250 = tpu.reciprocal %249 {approx = true} : vector<64x1xf32> -> vector<64x1xf32>
    %251 = vector.broadcast %250 : vector<64x1xf32> to vector<64x16xf32>
    %252 = arith.mulf %247, %251 : vector<64x16xf32>
    %cst_125 = arith.constant dense<0.000000e+00> : vector<64x8xf32>
    %253 = tpu.matmul %252, %236, %cst_125 {dimension_numbers = #tpu.dot_dimension_numbers<[1], [0], [0], [1], [0, 0, 1, 1], [], []>} : vector<64x16xf32>, vector<16x8xf32>, vector<64x8xf32> -> vector<64x8xf32>
    %254 = arith.mulf %253, %2 : vector<64x8xf32>
    %255 = vector.extract_strided_slice %254 {offsets = [0, 0], sizes = [16, 8], strides = [1, 1]} : vector<64x8xf32> to vector<16x8xf32>
    %256 = vector.extract_strided_slice %254 {offsets = [16, 0], sizes = [16, 8], strides = [1, 1]} : vector<64x8xf32> to vector<16x8xf32>
    %257 = arith.addf %255, %256 : vector<16x8xf32>
    %258 = vector.extract_strided_slice %254 {offsets = [32, 0], sizes = [16, 8], strides = [1, 1]} : vector<64x8xf32> to vector<16x8xf32>
    %259 = arith.addf %257, %258 : vector<16x8xf32>
    %260 = vector.extract_strided_slice %254 {offsets = [48, 0], sizes = [16, 8], strides = [1, 1]} : vector<64x8xf32> to vector<16x8xf32>
    %261 = arith.addf %259, %260 : vector<16x8xf32>
    %c2_126 = arith.constant 2 : index
    %c0_127 = arith.constant 0 : index
    %c0_128 = arith.constant 0 : index
    %262 = vector.load %arg5[%c2_126, %c0_127, %c0_128] : memref<4x8x8xf32, #tpu.memory_space<vmem>>, vector<1x8x8xf32>
    %263 = vector.shape_cast %262 : vector<1x8x8xf32> to vector<8x8xf32>
    %cst_129 = arith.constant dense<0.000000e+00> : vector<16x8xf32>
    %264 = tpu.matmul %261, %263, %cst_129 {dimension_numbers = #tpu.dot_dimension_numbers<[1], [0], [0], [1], [0, 0, 1, 1], [], []>} : vector<16x8xf32>, vector<8x8xf32>, vector<16x8xf32> -> vector<16x8xf32>
    %c2_130 = arith.constant 2 : index
    %c0_131 = arith.constant 0 : index
    %c0_132 = arith.constant 0 : index
    %265 = vector.load %arg6[%c2_130, %c0_131, %c0_132] : memref<4x1x8xf32, #tpu.memory_space<vmem>>, vector<1x1x8xf32>
    %266 = vector.shape_cast %265 : vector<1x1x8xf32> to vector<1x8xf32>
    %267 = vector.broadcast %266 : vector<1x8xf32> to vector<16x8xf32>
    %268 = arith.addf %264, %267 : vector<16x8xf32>
    %269 = arith.addf %226, %268 : vector<16x8xf32>
    %c2_133 = arith.constant 2 : index
    %c0_134 = arith.constant 0 : index
    %c0_135 = arith.constant 0 : index
    %270 = vector.load %arg7[%c2_133, %c0_134, %c0_135] : memref<4x1x8xf32, #tpu.memory_space<vmem>>, vector<1x1x8xf32>
    %271 = vector.shape_cast %270 : vector<1x1x8xf32> to vector<1x8xf32>
    %c2_136 = arith.constant 2 : index
    %c0_137 = arith.constant 0 : index
    %c0_138 = arith.constant 0 : index
    %272 = vector.load %arg8[%c2_136, %c0_137, %c0_138] : memref<4x1x8xf32, #tpu.memory_space<vmem>>, vector<1x1x8xf32>
    %273 = vector.shape_cast %272 : vector<1x1x8xf32> to vector<1x8xf32>
    %cst_139 = arith.constant dense<0.000000e+00> : vector<16xf32>
    %274 = vector.multi_reduction <add>, %269, %cst_139 [1] : vector<16x8xf32> to vector<16xf32>
    %275 = vector.shape_cast %274 : vector<16xf32> to vector<16x1xf32>
    %cst_140 = arith.constant 8.000000e+00 : f32
    %276 = vector.broadcast %cst_140 : f32 to vector<16x1xf32>
    %277 = arith.divf %275, %276 : vector<16x1xf32>
    %278 = vector.broadcast %277 : vector<16x1xf32> to vector<16x8xf32>
    %279 = arith.subf %269, %278 : vector<16x8xf32>
    %280 = arith.mulf %279, %279 : vector<16x8xf32>
    %cst_141 = arith.constant dense<0.000000e+00> : vector<16xf32>
    %281 = vector.multi_reduction <add>, %280, %cst_141 [1] : vector<16x8xf32> to vector<16xf32>
    %282 = vector.shape_cast %281 : vector<16xf32> to vector<16x1xf32>
    %cst_142 = arith.constant 8.000000e+00 : f32
    %283 = vector.broadcast %cst_142 : f32 to vector<16x1xf32>
    %284 = arith.divf %282, %283 : vector<16x1xf32>
    %285 = vector.broadcast %277 : vector<16x1xf32> to vector<16x8xf32>
    %286 = arith.subf %269, %285 : vector<16x8xf32>
    %cst_143 = arith.constant 9.99999974E-6 : f32
    %287 = vector.broadcast %cst_143 : f32 to vector<16x1xf32>
    %288 = arith.addf %284, %287 : vector<16x1xf32>
    %289 = math.rsqrt %288 : vector<16x1xf32>
    %290 = vector.broadcast %289 : vector<16x1xf32> to vector<16x8xf32>
    %291 = arith.mulf %286, %290 : vector<16x8xf32>
    %292 = vector.broadcast %271 : vector<1x8xf32> to vector<16x8xf32>
    %293 = arith.mulf %291, %292 : vector<16x8xf32>
    %294 = vector.broadcast %273 : vector<1x8xf32> to vector<16x8xf32>
    %295 = arith.addf %293, %294 : vector<16x8xf32>
    %c2_144 = arith.constant 2 : index
    %c0_145 = arith.constant 0 : index
    %c0_146 = arith.constant 0 : index
    %296 = vector.load %arg9[%c2_144, %c0_145, %c0_146] : memref<4x8x32xf32, #tpu.memory_space<vmem>>, vector<1x8x32xf32>
    %297 = vector.shape_cast %296 : vector<1x8x32xf32> to vector<8x32xf32>
    %cst_147 = arith.constant dense<0.000000e+00> : vector<16x32xf32>
    %298 = tpu.matmul %295, %297, %cst_147 {dimension_numbers = #tpu.dot_dimension_numbers<[1], [0], [0], [1], [0, 0, 1, 1], [], []>} : vector<16x8xf32>, vector<8x32xf32>, vector<16x32xf32> -> vector<16x32xf32>
    %c2_148 = arith.constant 2 : index
    %c0_149 = arith.constant 0 : index
    %c0_150 = arith.constant 0 : index
    %299 = vector.load %arg10[%c2_148, %c0_149, %c0_150] : memref<4x1x32xf32, #tpu.memory_space<vmem>>, vector<1x1x32xf32>
    %300 = vector.shape_cast %299 : vector<1x1x32xf32> to vector<1x32xf32>
    %301 = vector.broadcast %300 : vector<1x32xf32> to vector<16x32xf32>
    %302 = arith.addf %298, %301 : vector<16x32xf32>
    %cst_151 = arith.constant 0.000000e+00 : f32
    %303 = vector.broadcast %cst_151 : f32 to vector<16x32xf32>
    %304 = arith.maximumf %302, %303 : vector<16x32xf32>
    %c2_152 = arith.constant 2 : index
    %c0_153 = arith.constant 0 : index
    %c0_154 = arith.constant 0 : index
    %305 = vector.load %arg11[%c2_152, %c0_153, %c0_154] : memref<4x32x8xf32, #tpu.memory_space<vmem>>, vector<1x32x8xf32>
    %306 = vector.shape_cast %305 : vector<1x32x8xf32> to vector<32x8xf32>
    %cst_155 = arith.constant dense<0.000000e+00> : vector<16x8xf32>
    %307 = tpu.matmul %304, %306, %cst_155 {dimension_numbers = #tpu.dot_dimension_numbers<[1], [0], [0], [1], [0, 0, 1, 1], [], []>} : vector<16x32xf32>, vector<32x8xf32>, vector<16x8xf32> -> vector<16x8xf32>
    %c2_156 = arith.constant 2 : index
    %c0_157 = arith.constant 0 : index
    %c0_158 = arith.constant 0 : index
    %308 = vector.load %arg12[%c2_156, %c0_157, %c0_158] : memref<4x1x8xf32, #tpu.memory_space<vmem>>, vector<1x1x8xf32>
    %309 = vector.shape_cast %308 : vector<1x1x8xf32> to vector<1x8xf32>
    %310 = vector.broadcast %309 : vector<1x8xf32> to vector<16x8xf32>
    %311 = arith.addf %307, %310 : vector<16x8xf32>
    %312 = arith.addf %295, %311 : vector<16x8xf32>
    %c2_159 = arith.constant 2 : index
    %c0_160 = arith.constant 0 : index
    %c0_161 = arith.constant 0 : index
    %313 = vector.load %arg13[%c2_159, %c0_160, %c0_161] : memref<4x1x8xf32, #tpu.memory_space<vmem>>, vector<1x1x8xf32>
    %314 = vector.shape_cast %313 : vector<1x1x8xf32> to vector<1x8xf32>
    %c2_162 = arith.constant 2 : index
    %c0_163 = arith.constant 0 : index
    %c0_164 = arith.constant 0 : index
    %315 = vector.load %arg14[%c2_162, %c0_163, %c0_164] : memref<4x1x8xf32, #tpu.memory_space<vmem>>, vector<1x1x8xf32>
    %316 = vector.shape_cast %315 : vector<1x1x8xf32> to vector<1x8xf32>
    %cst_165 = arith.constant dense<0.000000e+00> : vector<16xf32>
    %317 = vector.multi_reduction <add>, %312, %cst_165 [1] : vector<16x8xf32> to vector<16xf32>
    %318 = vector.shape_cast %317 : vector<16xf32> to vector<16x1xf32>
    %cst_166 = arith.constant 8.000000e+00 : f32
    %319 = vector.broadcast %cst_166 : f32 to vector<16x1xf32>
    %320 = arith.divf %318, %319 : vector<16x1xf32>
    %321 = vector.broadcast %320 : vector<16x1xf32> to vector<16x8xf32>
    %322 = arith.subf %312, %321 : vector<16x8xf32>
    %323 = arith.mulf %322, %322 : vector<16x8xf32>
    %cst_167 = arith.constant dense<0.000000e+00> : vector<16xf32>
    %324 = vector.multi_reduction <add>, %323, %cst_167 [1] : vector<16x8xf32> to vector<16xf32>
    %325 = vector.shape_cast %324 : vector<16xf32> to vector<16x1xf32>
    %cst_168 = arith.constant 8.000000e+00 : f32
    %326 = vector.broadcast %cst_168 : f32 to vector<16x1xf32>
    %327 = arith.divf %325, %326 : vector<16x1xf32>
    %328 = vector.broadcast %320 : vector<16x1xf32> to vector<16x8xf32>
    %329 = arith.subf %312, %328 : vector<16x8xf32>
    %cst_169 = arith.constant 9.99999974E-6 : f32
    %330 = vector.broadcast %cst_169 : f32 to vector<16x1xf32>
    %331 = arith.addf %327, %330 : vector<16x1xf32>
    %332 = math.rsqrt %331 : vector<16x1xf32>
    %333 = vector.broadcast %332 : vector<16x1xf32> to vector<16x8xf32>
    %334 = arith.mulf %329, %333 : vector<16x8xf32>
    %335 = vector.broadcast %314 : vector<1x8xf32> to vector<16x8xf32>
    %336 = arith.mulf %334, %335 : vector<16x8xf32>
    %337 = vector.broadcast %316 : vector<1x8xf32> to vector<16x8xf32>
    %338 = arith.addf %336, %337 : vector<16x8xf32>
    %c3 = arith.constant 3 : index
    %c0_170 = arith.constant 0 : index
    %c0_171 = arith.constant 0 : index
    %339 = vector.load %arg3[%c3, %c0_170, %c0_171] : memref<4x8x24xf32, #tpu.memory_space<vmem>>, vector<1x8x24xf32>
    %340 = vector.shape_cast %339 : vector<1x8x24xf32> to vector<8x24xf32>
    %cst_172 = arith.constant dense<0.000000e+00> : vector<16x24xf32>
    %341 = tpu.matmul %338, %340, %cst_172 {dimension_numbers = #tpu.dot_dimension_numbers<[1], [0], [0], [1], [0, 0, 1, 1], [], []>} : vector<16x8xf32>, vector<8x24xf32>, vector<16x24xf32> -> vector<16x24xf32>
    %c3_173 = arith.constant 3 : index
    %c0_174 = arith.constant 0 : index
    %c0_175 = arith.constant 0 : index
    %342 = vector.load %arg4[%c3_173, %c0_174, %c0_175] : memref<4x1x24xf32, #tpu.memory_space<vmem>>, vector<1x1x24xf32>
    %343 = vector.shape_cast %342 : vector<1x1x24xf32> to vector<1x24xf32>
    %344 = vector.broadcast %343 : vector<1x24xf32> to vector<16x24xf32>
    %345 = arith.addf %341, %344 : vector<16x24xf32>
    %346 = vector.extract_strided_slice %345 {offsets = [0, 0], sizes = [16, 8], strides = [1, 1]} : vector<16x24xf32> to vector<16x8xf32>
    %347 = vector.extract_strided_slice %345 {offsets = [0, 8], sizes = [16, 8], strides = [1, 1]} : vector<16x24xf32> to vector<16x8xf32>
    %348 = vector.extract_strided_slice %345 {offsets = [0, 16], sizes = [16, 8], strides = [1, 1]} : vector<16x24xf32> to vector<16x8xf32>
    %349 = tpu.concatenate %346, %346, %346, %346 in 0 : vector<16x8xf32>, vector<16x8xf32>, vector<16x8xf32>, vector<16x8xf32> -> vector<64x8xf32>
    %350 = arith.mulf %349, %2 : vector<64x8xf32>
    %cst_176 = arith.constant dense<0.000000e+00> : vector<64x16xf32>
    %351 = tpu.matmul %350, %347, %cst_176 {dimension_numbers = #tpu.dot_dimension_numbers<[1], [1], [0], [0], [0, 0, 1, 0], [], []>} : vector<64x8xf32>, vector<16x8xf32>, vector<64x16xf32> -> vector<64x16xf32>
    %cst_177 = arith.constant 0.707106769 : f32
    %352 = vector.broadcast %cst_177 : f32 to vector<64x16xf32>
    %353 = arith.mulf %351, %352 : vector<64x16xf32>
    %354 = arith.addf %353, %1 : vector<64x16xf32>
    %cst_178 = arith.constant dense<0xFF800000> : vector<64xf32>
    %355 = vector.multi_reduction <maximumf>, %354, %cst_178 [1] : vector<64x16xf32> to vector<64xf32>
    %356 = vector.shape_cast %355 : vector<64xf32> to vector<64x1xf32>
    %357 = vector.broadcast %356 : vector<64x1xf32> to vector<64x16xf32>
    %358 = arith.subf %354, %357 : vector<64x16xf32>
    %359 = math.exp %358 : vector<64x16xf32>
    %cst_179 = arith.constant dense<0.000000e+00> : vector<64xf32>
    %360 = vector.multi_reduction <add>, %359, %cst_179 [1] : vector<64x16xf32> to vector<64xf32>
    %361 = vector.shape_cast %360 : vector<64xf32> to vector<64x1xf32>
    %362 = tpu.reciprocal %361 {approx = true} : vector<64x1xf32> -> vector<64x1xf32>
    %363 = vector.broadcast %362 : vector<64x1xf32> to vector<64x16xf32>
    %364 = arith.mulf %359, %363 : vector<64x16xf32>
    %cst_180 = arith.constant dense<0.000000e+00> : vector<64x8xf32>
    %365 = tpu.matmul %364, %348, %cst_180 {dimension_numbers = #tpu.dot_dimension_numbers<[1], [0], [0], [1], [0, 0, 1, 1], [], []>} : vector<64x16xf32>, vector<16x8xf32>, vector<64x8xf32> -> vector<64x8xf32>
    %366 = arith.mulf %365, %2 : vector<64x8xf32>
    %367 = vector.extract_strided_slice %366 {offsets = [0, 0], sizes = [16, 8], strides = [1, 1]} : vector<64x8xf32> to vector<16x8xf32>
    %368 = vector.extract_strided_slice %366 {offsets = [16, 0], sizes = [16, 8], strides = [1, 1]} : vector<64x8xf32> to vector<16x8xf32>
    %369 = arith.addf %367, %368 : vector<16x8xf32>
    %370 = vector.extract_strided_slice %366 {offsets = [32, 0], sizes = [16, 8], strides = [1, 1]} : vector<64x8xf32> to vector<16x8xf32>
    %371 = arith.addf %369, %370 : vector<16x8xf32>
    %372 = vector.extract_strided_slice %366 {offsets = [48, 0], sizes = [16, 8], strides = [1, 1]} : vector<64x8xf32> to vector<16x8xf32>
    %373 = arith.addf %371, %372 : vector<16x8xf32>
    %c3_181 = arith.constant 3 : index
    %c0_182 = arith.constant 0 : index
    %c0_183 = arith.constant 0 : index
    %374 = vector.load %arg5[%c3_181, %c0_182, %c0_183] : memref<4x8x8xf32, #tpu.memory_space<vmem>>, vector<1x8x8xf32>
    %375 = vector.shape_cast %374 : vector<1x8x8xf32> to vector<8x8xf32>
    %cst_184 = arith.constant dense<0.000000e+00> : vector<16x8xf32>
    %376 = tpu.matmul %373, %375, %cst_184 {dimension_numbers = #tpu.dot_dimension_numbers<[1], [0], [0], [1], [0, 0, 1, 1], [], []>} : vector<16x8xf32>, vector<8x8xf32>, vector<16x8xf32> -> vector<16x8xf32>
    %c3_185 = arith.constant 3 : index
    %c0_186 = arith.constant 0 : index
    %c0_187 = arith.constant 0 : index
    %377 = vector.load %arg6[%c3_185, %c0_186, %c0_187] : memref<4x1x8xf32, #tpu.memory_space<vmem>>, vector<1x1x8xf32>
    %378 = vector.shape_cast %377 : vector<1x1x8xf32> to vector<1x8xf32>
    %379 = vector.broadcast %378 : vector<1x8xf32> to vector<16x8xf32>
    %380 = arith.addf %376, %379 : vector<16x8xf32>
    %381 = arith.addf %338, %380 : vector<16x8xf32>
    %c3_188 = arith.constant 3 : index
    %c0_189 = arith.constant 0 : index
    %c0_190 = arith.constant 0 : index
    %382 = vector.load %arg7[%c3_188, %c0_189, %c0_190] : memref<4x1x8xf32, #tpu.memory_space<vmem>>, vector<1x1x8xf32>
    %383 = vector.shape_cast %382 : vector<1x1x8xf32> to vector<1x8xf32>
    %c3_191 = arith.constant 3 : index
    %c0_192 = arith.constant 0 : index
    %c0_193 = arith.constant 0 : index
    %384 = vector.load %arg8[%c3_191, %c0_192, %c0_193] : memref<4x1x8xf32, #tpu.memory_space<vmem>>, vector<1x1x8xf32>
    %385 = vector.shape_cast %384 : vector<1x1x8xf32> to vector<1x8xf32>
    %cst_194 = arith.constant dense<0.000000e+00> : vector<16xf32>
    %386 = vector.multi_reduction <add>, %381, %cst_194 [1] : vector<16x8xf32> to vector<16xf32>
    %387 = vector.shape_cast %386 : vector<16xf32> to vector<16x1xf32>
    %cst_195 = arith.constant 8.000000e+00 : f32
    %388 = vector.broadcast %cst_195 : f32 to vector<16x1xf32>
    %389 = arith.divf %387, %388 : vector<16x1xf32>
    %390 = vector.broadcast %389 : vector<16x1xf32> to vector<16x8xf32>
    %391 = arith.subf %381, %390 : vector<16x8xf32>
    %392 = arith.mulf %391, %391 : vector<16x8xf32>
    %cst_196 = arith.constant dense<0.000000e+00> : vector<16xf32>
    %393 = vector.multi_reduction <add>, %392, %cst_196 [1] : vector<16x8xf32> to vector<16xf32>
    %394 = vector.shape_cast %393 : vector<16xf32> to vector<16x1xf32>
    %cst_197 = arith.constant 8.000000e+00 : f32
    %395 = vector.broadcast %cst_197 : f32 to vector<16x1xf32>
    %396 = arith.divf %394, %395 : vector<16x1xf32>
    %397 = vector.broadcast %389 : vector<16x1xf32> to vector<16x8xf32>
    %398 = arith.subf %381, %397 : vector<16x8xf32>
    %cst_198 = arith.constant 9.99999974E-6 : f32
    %399 = vector.broadcast %cst_198 : f32 to vector<16x1xf32>
    %400 = arith.addf %396, %399 : vector<16x1xf32>
    %401 = math.rsqrt %400 : vector<16x1xf32>
    %402 = vector.broadcast %401 : vector<16x1xf32> to vector<16x8xf32>
    %403 = arith.mulf %398, %402 : vector<16x8xf32>
    %404 = vector.broadcast %383 : vector<1x8xf32> to vector<16x8xf32>
    %405 = arith.mulf %403, %404 : vector<16x8xf32>
    %406 = vector.broadcast %385 : vector<1x8xf32> to vector<16x8xf32>
    %407 = arith.addf %405, %406 : vector<16x8xf32>
    %c3_199 = arith.constant 3 : index
    %c0_200 = arith.constant 0 : index
    %c0_201 = arith.constant 0 : index
    %408 = vector.load %arg9[%c3_199, %c0_200, %c0_201] : memref<4x8x32xf32, #tpu.memory_space<vmem>>, vector<1x8x32xf32>
    %409 = vector.shape_cast %408 : vector<1x8x32xf32> to vector<8x32xf32>
    %cst_202 = arith.constant dense<0.000000e+00> : vector<16x32xf32>
    %410 = tpu.matmul %407, %409, %cst_202 {dimension_numbers = #tpu.dot_dimension_numbers<[1], [0], [0], [1], [0, 0, 1, 1], [], []>} : vector<16x8xf32>, vector<8x32xf32>, vector<16x32xf32> -> vector<16x32xf32>
    %c3_203 = arith.constant 3 : index
    %c0_204 = arith.constant 0 : index
    %c0_205 = arith.constant 0 : index
    %411 = vector.load %arg10[%c3_203, %c0_204, %c0_205] : memref<4x1x32xf32, #tpu.memory_space<vmem>>, vector<1x1x32xf32>
    %412 = vector.shape_cast %411 : vector<1x1x32xf32> to vector<1x32xf32>
    %413 = vector.broadcast %412 : vector<1x32xf32> to vector<16x32xf32>
    %414 = arith.addf %410, %413 : vector<16x32xf32>
    %cst_206 = arith.constant 0.000000e+00 : f32
    %415 = vector.broadcast %cst_206 : f32 to vector<16x32xf32>
    %416 = arith.maximumf %414, %415 : vector<16x32xf32>
    %c3_207 = arith.constant 3 : index
    %c0_208 = arith.constant 0 : index
    %c0_209 = arith.constant 0 : index
    %417 = vector.load %arg11[%c3_207, %c0_208, %c0_209] : memref<4x32x8xf32, #tpu.memory_space<vmem>>, vector<1x32x8xf32>
    %418 = vector.shape_cast %417 : vector<1x32x8xf32> to vector<32x8xf32>
    %cst_210 = arith.constant dense<0.000000e+00> : vector<16x8xf32>
    %419 = tpu.matmul %416, %418, %cst_210 {dimension_numbers = #tpu.dot_dimension_numbers<[1], [0], [0], [1], [0, 0, 1, 1], [], []>} : vector<16x32xf32>, vector<32x8xf32>, vector<16x8xf32> -> vector<16x8xf32>
    %c3_211 = arith.constant 3 : index
    %c0_212 = arith.constant 0 : index
    %c0_213 = arith.constant 0 : index
    %420 = vector.load %arg12[%c3_211, %c0_212, %c0_213] : memref<4x1x8xf32, #tpu.memory_space<vmem>>, vector<1x1x8xf32>
    %421 = vector.shape_cast %420 : vector<1x1x8xf32> to vector<1x8xf32>
    %422 = vector.broadcast %421 : vector<1x8xf32> to vector<16x8xf32>
    %423 = arith.addf %419, %422 : vector<16x8xf32>
    %424 = arith.addf %407, %423 : vector<16x8xf32>
    %c3_214 = arith.constant 3 : index
    %c0_215 = arith.constant 0 : index
    %c0_216 = arith.constant 0 : index
    %425 = vector.load %arg13[%c3_214, %c0_215, %c0_216] : memref<4x1x8xf32, #tpu.memory_space<vmem>>, vector<1x1x8xf32>
    %426 = vector.shape_cast %425 : vector<1x1x8xf32> to vector<1x8xf32>
    %c3_217 = arith.constant 3 : index
    %c0_218 = arith.constant 0 : index
    %c0_219 = arith.constant 0 : index
    %427 = vector.load %arg14[%c3_217, %c0_218, %c0_219] : memref<4x1x8xf32, #tpu.memory_space<vmem>>, vector<1x1x8xf32>
    %428 = vector.shape_cast %427 : vector<1x1x8xf32> to vector<1x8xf32>
    %cst_220 = arith.constant dense<0.000000e+00> : vector<16xf32>
    %429 = vector.multi_reduction <add>, %424, %cst_220 [1] : vector<16x8xf32> to vector<16xf32>
    %430 = vector.shape_cast %429 : vector<16xf32> to vector<16x1xf32>
    %cst_221 = arith.constant 8.000000e+00 : f32
    %431 = vector.broadcast %cst_221 : f32 to vector<16x1xf32>
    %432 = arith.divf %430, %431 : vector<16x1xf32>
    %433 = vector.broadcast %432 : vector<16x1xf32> to vector<16x8xf32>
    %434 = arith.subf %424, %433 : vector<16x8xf32>
    %435 = arith.mulf %434, %434 : vector<16x8xf32>
    %cst_222 = arith.constant dense<0.000000e+00> : vector<16xf32>
    %436 = vector.multi_reduction <add>, %435, %cst_222 [1] : vector<16x8xf32> to vector<16xf32>
    %437 = vector.shape_cast %436 : vector<16xf32> to vector<16x1xf32>
    %cst_223 = arith.constant 8.000000e+00 : f32
    %438 = vector.broadcast %cst_223 : f32 to vector<16x1xf32>
    %439 = arith.divf %437, %438 : vector<16x1xf32>
    %440 = vector.broadcast %432 : vector<16x1xf32> to vector<16x8xf32>
    %441 = arith.subf %424, %440 : vector<16x8xf32>
    %cst_224 = arith.constant 9.99999974E-6 : f32
    %442 = vector.broadcast %cst_224 : f32 to vector<16x1xf32>
    %443 = arith.addf %439, %442 : vector<16x1xf32>
    %444 = math.rsqrt %443 : vector<16x1xf32>
    %445 = vector.broadcast %444 : vector<16x1xf32> to vector<16x8xf32>
    %446 = arith.mulf %441, %445 : vector<16x8xf32>
    %447 = vector.broadcast %426 : vector<1x8xf32> to vector<16x8xf32>
    %448 = arith.mulf %446, %447 : vector<16x8xf32>
    %449 = vector.broadcast %428 : vector<1x8xf32> to vector<16x8xf32>
    %450 = arith.addf %448, %449 : vector<16x8xf32>
    %c0_225 = arith.constant 0 : index
    %c0_226 = arith.constant 0 : index
    %451 = vector.load %arg15[%c0_225, %c0_226] : memref<16x8xf32, #tpu.memory_space<vmem>>, vector<16x8xf32>
    tpu.vector_store %arg15[%c0_225, %c0_226], %450 {strides = array<i32>} : memref<16x8xf32, #tpu.memory_space<vmem>>, vector<16x8xf32>,
    return
  }
}

</mosaic_0001>

<bundles_post_ra>
// kernel: encoder_forward.1
= control target key start
LH: loop header
LB: loop body
LE: loop exit
PB: predicated region body
PF: predicated region fallthrough
CT: control target
= control target key end

     0   :  { %vm77_vm0 = vcmask 64512   ;;  %s5232_s0 = inlined_call_operand.vmem [shape: f32[16,8], index: 0, kind: input, shape index: {}]   ;;  %s5233_s1 = inlined_call_operand.vmem [shape: f32[64,16], index: 1, kind: input, shape index: {}]   ;;  %s5234_s2 = inlined_call_operand.vmem [shape: f32[64,8], index: 2, kind: input, shape index: {}]   ;;  %s5235_s3 = inlined_call_operand.vmem [shape: f32[4,8,24], index: 3, kind: input, shape index: {}]   ;;  %s5236_s4 = inlined_call_operand.vmem [shape: f32[4,1,24], index: 4, kind: input, shape index: {}]   ;;  %s5237_s5 = inlined_call_operand.vmem [shape: f32[4,8,8], index: 5, kind: input, shape index: {}]   ;;  %s5238_s6 = inlined_call_operand.vmem [shape: f32[4,1,8], index: 6, kind: input, shape index: {}]   ;;  %s5239_s7 = inlined_call_operand.vmem [shape: f32[4,1,8], index: 7, kind: input, shape index: {}]   ;;  %s5240_s8 = inlined_call_operand.vmem [shape: f32[4,1,8], index: 8, kind: input, shape index: {}]   ;;  %s5241_s9 = inlined_call_operand.vmem [shape: f32[4,8,32], index: 9, kind: input, shape index: {}]   ;;  %s5242_s10 = inlined_call_operand.vmem [shape: f32[4,1,32], index: 10, kind: input, shape index: {}]   ;;  %s5243_s11 = inlined_call_operand.vmem [shape: f32[4,32,8], index: 11, kind: input, shape index: {}]   ;;  %s5244_s12 = inlined_call_operand.vmem [shape: f32[4,1,8], index: 12, kind: input, shape index: {}]   ;;  %s5245_s13 = inlined_call_operand.vmem [shape: f32[4,1,8], index: 13, kind: input, shape index: {}]   ;;  %s5246_s14 = inlined_call_operand.vmem [shape: f32[4,1,8], index: 14, kind: input, shape index: {}]   ;;  %s5247_s15 = inlined_call_operand.hbm [shape: f32[16,8], index: 15, kind: output, shape index: {}]  }
   0x1   :  { %v69_v0 = vld [vmem:[%s5235_s3] sm:$0xff]  ;;  %v4505_v2 = vld [vmem:[%s5232_s0 + $0x8] sm:$0xff] }
   0x2   :  { %v4500_v1 = vld [vmem:[%s5232_s0] sm:$0xff]  ;;  %3860 = vmatprep.subr.mxu1 %v69_v0 }
   0x3   :  { %3862 = vmatprep.mubr.msk.f32.mxu1 %vm77_vm0, %v4500_v1 }
   0x4   :  { %20 = vsyncpa [#allocation3], 0  ;;  %3861 = vmatpush3.msra.mxu1 %v69_v0  ;;  %v3539_v3 = vld [vmem:[%s5236_s4] ss:$0 sm:$0xff]  ;;  %s4409_s0 = smov 120   ;;  %v4538_v16 = vld [vmem:[%s5234_s2 + $0x8] sm:$0xff] }
   0x5   :  { %3863 = vmatmul.mubr.msk.f32.vlgmr.msra.gmra.mrb[0].mxu1 %vm77_vm0, %v4505_v2  ;;  %v4517_v7 = vld [vmem:[%s5234_s2] sm:$0xff]  ;;  %vm4527_vm1 = vmpackc.low %vm77_vm0, %vm77_vm0  ;;  %v4543_v17 = vld [vmem:[%s5234_s2 + $0x10] sm:$0xff]  ;;  %vm322_vm2 = vcmask 130048   ;;  %s4410_s28 = smov 112   ;;  %vm798_vm3 = vcmask 261120  }
   0x6   :  { %v4550_v20 = vld [vmem:[%s5234_s2 + $0x18] sm:$0xff]  ;;  %v4556_v21 = vld [vmem:[%s5234_s2 + $0x20] sm:$0xff]  ;;  %v4564_v24 = vld [vmem:[%s5234_s2 + $0x28] sm:$0xff] }
   0x7   :  { %v4570_v25 = vld [vmem:[%s5234_s2 + $0x30] sm:$0xff]  ;;  %v4578_v28 = vld [vmem:[%s5234_s2 + $0x38] sm:$0xff]  ;;  %v4587_v31 = vld [vmem:[%s5233_s1 + $0x8] sm:$0xff] }
   0x8   :  { %v4592_v34 = vld [vmem:[%s5233_s1] sm:$0xff]  ;;  %v4599_v39 = vld [vmem:[%s5233_s1 + $0x18] sm:$0xff]  ;;  %v4606_v45 = vld [vmem:[%s5233_s1 + $0x10] sm:$0xff] }
   0x9   :  { %v4614_v52 = vld [vmem:[%s5233_s1 + $0x28] sm:$0xff]  ;;  %v4621_v58 = vld [vmem:[%s5233_s1 + $0x20] sm:$0xff]  ;;  %v4628_v62 = vld [vmem:[%s5233_s1 + $0x30] sm:$0xff] }
  0xd8   :  { %v3864_v4 = vpop.f32.mrb[0].mxu1 }
  0xd9   :  { %v156_v5 = vadd.f32 %v3864_v4, %v3539_v3  ;;  %v150_v6 = vpop.f32.mrb[1].mxu1  ;;  %v4635_v4 = vld [vmem:[%s5233_s1 + $0x38] sm:$0xff] }
  0xda   :  { %v151_v8 = vadd.f32 %v3539_v3, %v150_v6 }
  0xdb   :  { %v160_v18 = vmul.f32 %v156_v5, %v4538_v16  ;;  %v162_v22 = vmul.f32 %v156_v5, %v4550_v20  ;;  %v164_v26 = vmul.f32 %v156_v5, %v4564_v24  ;;  %v166_v29 = vmul.f32 %v156_v5, %v4578_v28 }
  0xdc   :  { %v4519_v9 = vpack.i.bf16 %v156_v5, %v151_v8  ;;  %v159_v10 = vmul.f32 %v151_v8, %v4517_v7  ;;  %v161_v19 = vmul.f32 %v151_v8, %v4543_v17  ;;  %v163_v23 = vmul.f32 %v151_v8, %v4556_v21 }
  0xdd   :  { %v165_v27 = vmul.f32 %v151_v8, %v4570_v25 }
  0xde   :  { %4170 = vrot.lane.b32.xlu0 %v4519_v9, %s4409_s0  ;;  %3869 = vmatprep.mubr.msk.f32.mxu1 %vm77_vm0, %v159_v10 }
 0x150   :  { %v4171_v11 = vpop.permute.xlu0 %4170 }
 0x151   :  { %v4173_v12 = vunpack.i.h.bf16 %v4171_v11  ;;  %v4172_v13 = vunpack.i.l.bf16 %v4171_v11 }
 0x153   :  { %v4092_v15 = vpack.c.bf16 %v4173_v12, %v4172_v13 }
 0x155   :  { %4094 = vmatprep.subr.msk.bf16.mxu1 %vm4527_vm1, %v4092_v15 }
 0x156   :  { %4097 = vmatpush3.bf16.xpose.msk.msra.mxu1 %vm4527_vm1, %v4092_v15 }
 0x15d   :  { %3870 = vmatmul.mubr.msk.f32.vlgmr.msra.gmra.mrb[2].mxu1 %vm77_vm0, %v160_v18 }
 0x15e   :  { %3872 = vmatprep.mubr.msk.f32.mxu1 %vm77_vm0, %v161_v19 }
 0x161   :  { %3873 = vmatmul.mubr.msk.f32.gmra.mrb[4].mxu1 %vm77_vm0, %v162_v22 }
 0x162   :  { %3875 = vmatprep.mubr.msk.f32.mxu1 %vm77_vm0, %v163_v23 }
 0x165   :  { %3876 = vmatmul.mubr.msk.f32.gmra.mrb[6].mxu1 %vm77_vm0, %v164_v26 }
 0x166   :  { %3878 = vmatprep.mubr.msk.f32.mxu1 %vm77_vm0, %v165_v27 }
 0x169   :  { %3879 = vmatmul.mubr.msk.f32.gmra.mrb[8].mxu1 %vm77_vm0, %v166_v29 }
 0x230   :  { %v3871_v30 = vpop.f32.mrb[2].mxu1 }
 0x231   :  { %v307_v32 = vmul.f32 0.70710677, %v3871_v30  ;;  %v267_v33 = vpop.f32.mrb[3].mxu1 }
 0x232   :  { %v306_v35 = vmul.f32 0.70710677, %v267_v33 }
 0x233   :  { %v315_v36 = vadd.f32 %v307_v32, %v4587_v31 }
 0x234   :  { %v3874_v37 = vpop.f32.mrb[4].mxu1  ;;  %v314_v38 = vadd.f32 %v306_v35, %v4592_v34 }
 0x235   :  { %v309_v40 = vmul.f32 0.70710677, %v3874_v37  ;;  %v277_v41 = vpop.f32.mrb[5].mxu1  ;;  %v326_v42 = vsel %vm322_vm2, %v315_v36, -inf }
 0x236   :  { %v308_v43 = vmul.f32 0.70710677, %v277_v41  ;;  %327 = vmax.xlane.f32.xlu1 %v326_v42  ;;  %v323_v44 = vsel %vm322_vm2, %v314_v38, -inf }
 0x237   :  { %324 = vmax.xlane.f32.xlu0 %v323_v44  ;;  %v317_v46 = vadd.f32 %v309_v40, %v4599_v39 }
 0x238   :  { %v3877_v47 = vpop.f32.mrb[6].mxu1  ;;  %v316_v51 = vadd.f32 %v308_v43, %v4606_v45 }
 0x239   :  { %v311_v48 = vmul.f32 0.70710677, %v3877_v47  ;;  %v287_v49 = vpop.f32.mrb[7].mxu1  ;;  %v332_v50 = vsel %vm322_vm2, %v317_v46, -inf }
 0x23a   :  { %333 = vmax.xlane.f32.xlu1 %v332_v50  ;;  %v310_v54 = vmul.f32 0.70710677, %v287_v49  ;;  %v329_v56 = vsel %vm322_vm2, %v316_v51, -inf }
 0x23b   :  { %v319_v57 = vadd.f32 %v311_v48, %v4614_v52 }
 0x23c   :  { %v3880_v53 = vpop.f32.mrb[8].mxu1  ;;  %v318_v61 = vadd.f32 %v310_v54, %v4621_v58 }
 0x23d   :  { %v297_v55 = vpop.f32.mrb[9].mxu1  ;;  %v338_v60 = vsel %vm322_vm2, %v319_v57, -inf  ;;  %v313_v63 = vmul.f32 0.70710677, %v3880_v53 }
 0x23e   :  { %330 = vmax.xlane.f32.xlu1 %v329_v56  ;;  %v312_v59 = vmul.f32 0.70710677, %v297_v55  ;;  %v335_v0 = vsel %vm322_vm2, %v318_v61, -inf }
 0x23f   :  { %v321_v6 = vadd.f32 %v313_v63, %v4635_v4 }
 0x240   :  { %v320_v3 = vadd.f32 %v312_v59, %v4628_v62 }
 0x241   :  { %v344_v8 = vsel %vm322_vm2, %v321_v6, -inf }
 0x242   :  { %339 = vmax.xlane.f32.xlu1 %v338_v60  ;;  %v341_v5 = vsel %vm322_vm2, %v320_v3, -inf }
 0x246   :  { %336 = vmax.xlane.f32.xlu1 %v335_v0 }
 0x24a   :  { %342 = vmax.xlane.f32.xlu1 %v341_v5 }
 0x24e   :  { %345 = vmax.xlane.f32.xlu1 %v344_v8 }
 0x2c3   :  { %v328_v10 = vpop.xlane.xlu1 %327 }
 0x2c4   :  { %v348_v11 = vsub.f32 %v315_v36, %v328_v10  ;;  %v325_v12 = vpop.xlane.xlu0 %324 }
 0x2c5   :  { %v347_v13 = vsub.f32 %v314_v38, %v325_v12 }
 0x2c6   :  { %v357_v15 = vmul.f32 1.442695, %v348_v11 }
 0x2c7   :  { %v355_v18 = vmul.f32 1.442695, %v347_v13  ;;  %v334_v19 = vpop.xlane.xlu1 %333 }
 0x2c8   :  { %v350_v22 = vsub.f32 %v317_v46, %v334_v19 }
 0x2c9   :  { %4209 = vpow2.f32 %v355_v18 }
 0x2ca   :  { %4211 = vpow2.f32 %v357_v15  ;;  %v361_v23 = vmul.f32 1.442695, %v350_v22 }
 0x2cb   :  { %v331_v26 = vpop.xlane.xlu1 %330 }
 0x2cc   :  { %v349_v27 = vsub.f32 %v316_v51, %v331_v26  ;;  %4213 = vpow2.f32 %v361_v23 }
 0x2ce   :  { %v359_v29 = vmul.f32 1.442695, %v349_v27 }
 0x2cf   :  { %v340_v30 = vpop.xlane.xlu1 %339 }
 0x2d0   :  { %4215 = vpow2.f32 %v359_v29  ;;  %v352_v32 = vsub.f32 %v319_v57, %v340_v30 }
 0x2d2   :  { %v365_v33 = vmul.f32 1.442695, %v352_v32 }
 0x2d3   :  { %v4210_v35 = vpop.eup %4209  ;;  %v337_v37 = vpop.xlane.xlu1 %336 }
 0x2d4   :  { %4217 = vpow2.f32 %v365_v33  ;;  %v351_v36 = vsub.f32 %v318_v61, %v337_v37  ;;  %v371_v38 = vsel %vm322_vm2, %v4210_v35, 0.0  ;;  %v4212_v40 = vpop.eup %4211 }
 0x2d5   :  { %372 = vadd.xlane.f32.xlu1 %v371_v38  ;;  %v374_v44 = vsel %vm322_vm2, %v4212_v40, 0.0 }
 0x2d6   :  { %v363_v41 = vmul.f32 1.442695, %v351_v36  ;;  %v4214_v46 = vpop.eup %4213 }
 0x2d7   :  { %v343_v42 = vpop.xlane.xlu1 %342  ;;  %v380_v53 = vsel %vm322_vm2, %v4214_v46, 0.0 }
 0x2d8   :  { %4219 = vpow2.f32 %v363_v41  ;;  %v353_v43 = vsub.f32 %v320_v3, %v343_v42 }
 0x2d9   :  { %375 = vadd.xlane.f32.xlu1 %v374_v44  ;;  %v560_v44 = vld [vmem:[%s5237_s5] sm:$0xff] }
 0x2da   :  { %v4216_v47 = vpop.eup %4215  ;;  %v367_v48 = vmul.f32 1.442695, %v353_v43 }
 0x2db   :  { %v346_v49 = vpop.xlane.xlu1 %345  ;;  %v377_v50 = vsel %vm322_vm2, %v4216_v47, 0.0 }
 0x2dc   :  { %4221 = vpow2.f32 %v367_v48  ;;  %v354_v51 = vsub.f32 %v321_v6, %v346_v49  ;;  %378 = vadd.xlane.f32.xlu0 %v377_v50 }
 0x2dd   :  { %381 = vadd.xlane.f32.xlu1 %v380_v53 }
 0x2de   :  { %v4218_v54 = vpop.eup %4217  ;;  %v369_v55 = vmul.f32 1.442695, %v354_v51 }
 0x2df   :  { %v386_v56 = vsel %vm322_vm2, %v4218_v54, 0.0 }
 0x2e0   :  { %4223 = vpow2.f32 %v369_v55 }
 0x2e1   :  { %387 = vadd.xlane.f32.xlu1 %v386_v56 }
 0x2e2   :  { %v4220_v57 = vpop.eup %4219 }
 0x2e3   :  { %v383_v59 = vsel %vm322_vm2, %v4220_v57, 0.0 }
 0x2e4   :  { %384 = vadd.xlane.f32.xlu0 %v383_v59 }
 0x2e6   :  { %v4222_v60 = vpop.eup %4221 }
 0x2e7   :  { %v389_v61 = vsel %vm322_vm2, %v4222_v60, 0.0 }
 0x2e8   :  { %390 = vadd.xlane.f32.xlu0 %v389_v61 }
 0x2ea   :  { %v4224_v63 = vpop.eup %4223 }
 0x2eb   :  { %v392_v0 = vsel %vm322_vm2, %v4224_v63, 0.0 }
 0x2ec   :  { %393 = vadd.xlane.f32.xlu1 %v392_v0 }
 0x2fe   :  { %4175 = vrot.lane.b32.xlu0 %v4519_v9, %s4410_s28 }
 0x362   :  { %v373_v3 = vpop.xlane.xlu1 %372 }
 0x363   :  { %4225 = vrcp.f32 %v373_v3 }
 0x366   :  { %v376_v5 = vpop.xlane.xlu1 %375 }
 0x367   :  { %4227 = vrcp.f32 %v376_v5 }
 0x369   :  { %v379_v8 = vpop.xlane.xlu0 %378 }
 0x36a   :  { %v382_v12 = vpop.xlane.xlu1 %381  ;;  %4229 = vrcp.f32 %v379_v8 }
 0x36b   :  { %4231 = vrcp.f32 %v382_v12  ;;  %v3560_v12 = vld [vmem:[%s5238_s6] ss:$0 sm:$0xff] }
 0x36d   :  { %v4226_v6 = vpop.eup %4225 }
 0x36e   :  { %v403_v10 = vmul.f32 %v4226_v6, %v4210_v35  ;;  %v388_v15 = vpop.xlane.xlu1 %387 }
 0x370   :  { %3885 = vmatprep.mubr.msk.f32.mxu0 %vm322_vm2, %v403_v10 }
 0x371   :  { %v385_v11 = vpop.xlane.xlu0 %384  ;;  %v4228_v26 = vpop.eup %4227 }
 0x372   :  { %4233 = vrcp.f32 %v385_v11  ;;  %v404_v29 = vmul.f32 %v4228_v26, %v4212_v40 }
 0x373   :  { %4235 = vrcp.f32 %v388_v15 }
 0x374   :  { %v4230_v27 = vpop.eup %4229 }
 0x375   :  { %v391_v13 = vpop.xlane.xlu0 %390  ;;  %v4232_v30 = vpop.eup %4231  ;;  %v405_v32 = vmul.f32 %v4230_v27, %v4216_v47 }
 0x376   :  { %4237 = vrcp.f32 %v391_v13  ;;  %v406_v35 = vmul.f32 %v4232_v30, %v4214_v46 }
 0x379   :  { %v4176_v18 = vpop.permute.xlu0 %4175  ;;  %v394_v9 = vpop.xlane.xlu1 %393 }
 0x37a   :  { %v4178_v19 = vunpack.i.h.bf16 %v4176_v18  ;;  %v4177_v22 = vunpack.i.l.bf16 %v4176_v18  ;;  %4239 = vrcp.f32 %v394_v9 }
 0x37c   :  { %v4098_v23 = vpack.c.bf16 %v4178_v19, %v4177_v22  ;;  %v4234_v33 = vpop.eup %4233 }
 0x37d   :  { %v4236_v37 = vpop.eup %4235  ;;  %v407_v36 = vmul.f32 %v4234_v33, %v4220_v57 }
 0x37e   :  { %4099 = vmatprep.subr.bf16.mxu0 %v4098_v23  ;;  %v408_v41 = vmul.f32 %v4236_v37, %v4218_v54 }
 0x37f   :  { %4101 = vmatpush3.bf16.msra.mxu0 %v4098_v23 }
 0x380   :  { %v4238_v38 = vpop.eup %4237  ;;  %3897 = vmatprep.subr.mxu0 %v560_v44 }
 0x381   :  { %v409_v43 = vmul.f32 %v4238_v38, %v4222_v60 }
 0x382   :  { %3886 = vmatmul.mubr.msk.f32.vlgmr.msra.gmra.mrb[0].mxu0 %vm322_vm2, %v404_v29 }
 0x383   :  { %3888 = vmatprep.mubr.msk.f32.mxu0 %vm322_vm2, %v405_v32  ;;  %3898 = vmatpush3.msra.mxu0 %v560_v44 }
 0x384   :  { %v4240_v42 = vpop.eup %4239 }
 0x385   :  { %v410_v40 = vmul.f32 %v4240_v42, %v4224_v63  ;;  %v788_v42 = vld [vmem:[%s5243_s11 + $0x8] sm:$0xff] }
 0x386   :  { %3889 = vmatmul.mubr.msk.f32.gmra.mrb[2].mxu0 %vm322_vm2, %v406_v35 }
 0x387   :  { %3891 = vmatprep.mubr.msk.f32.mxu0 %vm322_vm2, %v407_v36 }
 0x38a   :  { %3892 = vmatmul.mubr.msk.f32.gmra.mrb[4].mxu0 %vm322_vm2, %v408_v41  ;;  %v787_v41 = vld [vmem:[%s5243_s11] sm:$0xff] }
 0x38b   :  { %3894 = vmatprep.mubr.msk.f32.mxu0 %vm322_vm2, %v409_v43  ;;  %v4102_v43 = vpack.c.bf16 %v788_v42, %v787_v41  ;;  %v3573_v42 = vld [vmem:[%s5235_s3 + $0x8] sm:$0xff] }
 0x38d   :  { %4103 = vmatprep.subr.bf16.mxu0 %v4102_v43 }
 0x38e   :  { %3895 = vmatmul.mubr.msk.f32.gmra.mrb[6].mxu0 %vm322_vm2, %v410_v40 }
 0x455   :  { %v3887_v46 = vpop.f32.mrb[0].mxu0 }
 0x456   :  { %v507_v47 = vpop.f32.mrb[1].mxu0  ;;  %v547_v49 = vmul.f32 %v3887_v46, %v4538_v16 }
 0x457   :  { %v546_v53 = vmul.f32 %v507_v47, %v4517_v7 }
 0x459   :  { %v3890_v48 = vpop.f32.mrb[2].mxu0 }
 0x45a   :  { %v549_v50 = vmul.f32 %v3890_v48, %v4550_v20  ;;  %v517_v51 = vpop.f32.mrb[3].mxu0 }
 0x45b   :  { %v548_v54 = vmul.f32 %v517_v51, %v4543_v17  ;;  %v3563_v51 = vld [vmem:[%s5239_s7] ss:$0 sm:$0xff] }
 0x45c   :  { %v555_v55 = vadd.f32 %v549_v50, %v547_v49 }
 0x45d   :  { %v554_v56 = vadd.f32 %v548_v54, %v546_v53  ;;  %v3893_v57 = vpop.f32.mrb[4].mxu0  ;;  %v3564_v54 = vld [vmem:[%s5240_s8] ss:$0 sm:$0xff] }
 0x45e   :  { %v551_v59 = vmul.f32 %v3893_v57, %v4564_v24  ;;  %v527_v60 = vpop.f32.mrb[5].mxu0 }
 0x45f   :  { %v550_v61 = vmul.f32 %v527_v60, %v4556_v21 }
 0x460   :  { %v557_v63 = vadd.f32 %v555_v55, %v551_v59 }
 0x461   :  { %v556_v0 = vadd.f32 %v554_v56, %v550_v61  ;;  %v3896_v3 = vpop.f32.mrb[6].mxu0 }
 0x462   :  { %v553_v5 = vmul.f32 %v3896_v3, %v4578_v28  ;;  %v537_v6 = vpop.f32.mrb[7].mxu0 }
 0x463   :  { %v552_v8 = vmul.f32 %v537_v6, %v4570_v25 }
 0x464   :  { %v559_v10 = vadd.f32 %v557_v63, %v553_v5  ;;  %v789_v63 = vld [vmem:[%s5243_s11 + $0x10] sm:$0xff]  ;;  %v3565_v5 = vld [vmem:[%s5242_s10] ss:$0 sm:$0xff] }
 0x465   :  { %v558_v11 = vadd.f32 %v556_v0, %v552_v8  ;;  %v790_v0 = vld [vmem:[%s5243_s11 + $0x18] sm:$0xff] }
 0x466   :  { %v4106_v3 = vpack.c.bf16 %v790_v0, %v789_v63 }
 0x467   :  { %3899 = vmatprep.mubr.msk.f32.mxu0 %vm77_vm0, %v558_v11 }
 0x468   :  { %3900 = vmatmul.mubr.msk.f32.vlgmr.msra.gmra.mrb[8].mxu0 %vm77_vm0, %v559_v10 }
 0x469   :  { %4105 = vmatpush3.bf16.msra.mxu0 %v4102_v43 }
 0x46a   :  { %4107 = vmatprep.subr.bf16.mxu0 %v4106_v3 }
 0x46d   :  { %4109 = vmatpush3.bf16.msra.mxu0 %v4106_v3 }
 0x53b   :  { %v3901_v13 = vpop.f32.mrb[8].mxu0 }
 0x53c   :  { %v640_v15 = vpop.f32.mrb[9].mxu0  ;;  %v646_v18 = vadd.f32 %v3901_v13, %v3560_v12 }
 0x53d   :  { %v641_v19 = vadd.f32 %v3560_v12, %v640_v15  ;;  %v3568_v15 = vld [vmem:[%s5244_s12] ss:$0 sm:$0xff] }
 0x53e   :  { %v650_v23 = vadd.f32 %v646_v18, %v4505_v2  ;;  %v696_v2 = vld [vmem:[%s5241_s9] sm:$0xff] }
 0x53f   :  { %v649_v22 = vadd.f32 %v641_v19, %v4500_v1  ;;  %3902 = vmatprep.subr.mxu1 %v696_v2 }
 0x540   :  { %v656_v26 = vsel %vm77_vm0, %v650_v23, 0.0  ;;  %3903 = vmatpush3.msra.mxu1 %v696_v2 }
 0x541   :  { %v653_v9 = vsel %vm77_vm0, %v649_v22, 0.0  ;;  %3918 = vmatprep.subr.mxu1 %v3573_v42 }
 0x542   :  { %654 = vadd.xlane.f32.xlu1 %v653_v9 }
 0x546   :  { %657 = vadd.xlane.f32.xlu1 %v656_v26 }
 0x5cf   :  { %v655_v27 = vpop.xlane.xlu1 %654 }
 0x5d0   :  { %v660_v29 = vmul.f32 0.125, %v655_v27 }
 0x5d2   :  { %v662_v30 = vsub.f32 %v649_v22, %v660_v29 }
 0x5d3   :  { %v658_v32 = vpop.xlane.xlu1 %657 }
 0x5d4   :  { %v661_v33 = vmul.f32 0.125, %v658_v32  ;;  %v664_v35 = vmul.f32 %v662_v30, %v662_v30 }
 0x5d6   :  { %v663_v37 = vsub.f32 %v650_v23, %v661_v33  ;;  %v666_v36 = vsel %vm77_vm0, %v664_v35, 0.0 }
 0x5d7   :  { %667 = vadd.xlane.f32.xlu1 %v666_v36 }
 0x5d8   :  { %v665_v38 = vmul.f32 %v663_v37, %v663_v37 }
 0x5da   :  { %v669_v1 = vsel %vm77_vm0, %v665_v38, 0.0 }
 0x5db   :  { %670 = vadd.xlane.f32.xlu1 %v669_v1 }
 0x664   :  { %v668_v40 = vpop.xlane.xlu1 %667 }
 0x665   :  { %v672_v44 = vmul.f32 0.125, %v668_v40 }
 0x667   :  { %v674_v46 = vadd.f32 1e-05, %v672_v44 }
 0x668   :  { %v671_v47 = vpop.xlane.xlu1 %670 }
 0x669   :  { %4241 = vrsqrt.f32 %v674_v46  ;;  %v673_v48 = vmul.f32 0.125, %v671_v47 }
 0x66b   :  { %v675_v49 = vadd.f32 1e-05, %v673_v48 }
 0x66d   :  { %4243 = vrsqrt.f32 %v675_v49 }
 0x673   :  { %v4242_v50 = vpop.eup %4241 }
 0x674   :  { %v678_v53 = vmul.f32 %v4242_v50, %v662_v30  ;;  %v3571_v50 = vld [vmem:[%s5245_s13] ss:$0 sm:$0xff] }
 0x676   :  { %v686_v55 = vmul.f32 %v3563_v51, %v678_v53  ;;  %v3572_v53 = vld [vmem:[%s5246_s14] ss:$0 sm:$0xff] }
 0x677   :  { %v4244_v56 = vpop.eup %4243 }
 0x678   :  { %v679_v57 = vmul.f32 %v4244_v56, %v663_v37  ;;  %v694_v59 = vadd.f32 %v3564_v54, %v686_v55 }
 0x67a   :  { %v687_v60 = vmul.f32 %v3563_v51, %v679_v57  ;;  %3904 = vmatprep.mubr.msk.f32.mxu1 %vm77_vm0, %v694_v59 }
 0x67c   :  { %v695_v61 = vadd.f32 %v3564_v54, %v687_v60 }
 0x67e   :  { %3905 = vmatmul.mubr.msk.f32.vlgmr.msra.gmra.mrb[10].mxu1 %vm77_vm0, %v695_v61 }
 0x67f   :  { %3919 = vmatpush3.msra.mxu1 %v3573_v42 }
 0x751   :  { %v3906_v6 = vpop.f32.mrb[10].mxu1 }
 0x752   :  { %v782_v8 = vadd.f32 %v3906_v6, %v3565_v5  ;;  %v776_v10 = vpop.f32.mrb[11].mxu1 }
 0x753   :  { %v777_v11 = vadd.f32 %v3565_v5, %v776_v10 }
 0x754   :  { %v786_v13 = vmax.f32 %v782_v8, 0.0 }
 0x755   :  { %v785_v12 = vmax.f32 %v777_v11, 0.0 }
 0x757   :  { %3915 = vmatprep.mubr.msk.f32.mxu0 %vm798_vm3, %v785_v12 }
 0x758   :  { %3916 = vmatmul.mubr.msk.f32.vlgmr.msra.gmra.mrb[10].mxu0 %vm798_vm3, %v786_v13 }
 0x82b   :  { %v3917_v18 = vpop.f32.mrb[10].mxu0 }
 0x82c   :  { %v871_v19 = vpop.f32.mrb[11].mxu0  ;;  %v877_v22 = vadd.f32 %v3917_v18, %v3568_v15 }
 0x82d   :  { %v872_v9 = vadd.f32 %v3568_v15, %v871_v19 }
 0x82e   :  { %v881_v27 = vadd.f32 %v877_v22, %v695_v61  ;;  %v3575_v61 = vld [vmem:[%s5236_s4 + $0x1] ss:$0 sm:$0xff] }
 0x82f   :  { %v880_v23 = vadd.f32 %v872_v9, %v694_v59 }
 0x830   :  { %v887_v29 = vsel %vm77_vm0, %v881_v27, 0.0 }
 0x831   :  { %v884_v26 = vsel %vm77_vm0, %v880_v23, 0.0 }
 0x832   :  { %885 = vadd.xlane.f32.xlu1 %v884_v26 }
 0x836   :  { %888 = vadd.xlane.f32.xlu1 %v887_v29 }
 0x8bf   :  { %v886_v30 = vpop.xlane.xlu1 %885 }
 0x8c0   :  { %v890_v32 = vmul.f32 0.125, %v886_v30 }
 0x8c2   :  { %v892_v33 = vsub.f32 %v880_v23, %v890_v32 }
 0x8c3   :  { %v889_v35 = vpop.xlane.xlu1 %888 }
 0x8c4   :  { %v891_v37 = vmul.f32 0.125, %v889_v35  ;;  %v894_v36 = vmul.f32 %v892_v33, %v892_v33 }
 0x8c6   :  { %v893_v38 = vsub.f32 %v881_v27, %v891_v37  ;;  %v896_v1 = vsel %vm77_vm0, %v894_v36, 0.0 }
 0x8c7   :  { %897 = vadd.xlane.f32.xlu0 %v896_v1 }
 0x8c8   :  { %v895_v2 = vmul.f32 %v893_v38, %v893_v38 }
 0x8ca   :  { %v899_v41 = vsel %vm77_vm0, %v895_v2, 0.0 }
 0x8cb   :  { %900 = vadd.xlane.f32.xlu1 %v899_v41 }
 0x954   :  { %v898_v43 = vpop.xlane.xlu0 %897 }
 0x955   :  { %v902_v40 = vmul.f32 0.125, %v898_v43 }
 0x957   :  { %v904_v44 = vadd.f32 1e-05, %v902_v40 }
 0x958   :  { %v901_v46 = vpop.xlane.xlu1 %900 }
 0x959   :  { %4245 = vrsqrt.f32 %v904_v44  ;;  %v903_v47 = vmul.f32 0.125, %v901_v46 }
 0x95b   :  { %v905_v48 = vadd.f32 1e-05, %v903_v47 }
 0x95d   :  { %4247 = vrsqrt.f32 %v905_v48 }
 0x963   :  { %v4246_v49 = vpop.eup %4245 }
 0x964   :  { %v908_v51 = vmul.f32 %v4246_v49, %v892_v33 }
 0x966   :  { %v916_v54 = vmul.f32 %v3571_v50, %v908_v51 }
 0x967   :  { %v4248_v55 = vpop.eup %4247 }
 0x968   :  { %v909_v56 = vmul.f32 %v4248_v55, %v893_v38  ;;  %v4724_v57 = vadd.f32 %v3572_v53, %v916_v54 }
 0x96a   :  { %v917_v59 = vmul.f32 %v3571_v50, %v909_v56  ;;  %3920 = vmatprep.mubr.msk.f32.mxu1 %vm77_vm0, %v4724_v57 }
 0x96c   :  { %v4728_v60 = vadd.f32 %v3572_v53, %v917_v59 }
 0x96e   :  { %3921 = vmatmul.mubr.msk.f32.vlgmr.msra.gmra.mrb[12].mxu1 %vm77_vm0, %v4728_v60 }
 0xa41   :  { %v3922_v63 = vpop.f32.mrb[12].mxu1 }
 0xa42   :  { %v1014_v0 = vadd.f32 %v3922_v63, %v3575_v61  ;;  %v1008_v3 = vpop.f32.mrb[13].mxu1 }
 0xa43   :  { %v1009_v5 = vadd.f32 %v3575_v61, %v1008_v3 }
 0xa44   :  { %v1018_v15 = vmul.f32 %v1014_v0, %v4538_v16  ;;  %v1020_v19 = vmul.f32 %v1014_v0, %v4550_v20  ;;  %v1022_v9 = vmul.f32 %v1014_v0, %v4564_v24  ;;  %v1024_v26 = vmul.f32 %v1014_v0, %v4578_v28 }
 0xa45   :  { %v4735_v6 = vpack.i.bf16 %v1014_v0, %v1009_v5  ;;  %v1017_v8 = vmul.f32 %v1009_v5, %v4517_v7  ;;  %v1019_v18 = vmul.f32 %v1009_v5, %v4543_v17  ;;  %v1021_v22 = vmul.f32 %v1009_v5, %v4556_v21 }
 0xa46   :  { %v1023_v23 = vmul.f32 %v1009_v5, %v4570_v25 }
 0xa47   :  { %4180 = vrot.lane.b32.xlu1 %v4735_v6, %s4409_s0  ;;  %3927 = vmatprep.mubr.msk.f32.mxu1 %vm77_vm0, %v1017_v8 }
 0xab9   :  { %v4181_v10 = vpop.permute.xlu1 %4180 }
 0xaba   :  { %v4183_v11 = vunpack.i.h.bf16 %v4181_v10  ;;  %v4182_v12 = vunpack.i.l.bf16 %v4181_v10 }
 0xabc   :  { %v4110_v13 = vpack.c.bf16 %v4183_v11, %v4182_v12 }
 0xabe   :  { %4112 = vmatprep.subr.msk.bf16.mxu1 %vm4527_vm1, %v4110_v13 }
 0xabf   :  { %4115 = vmatpush3.bf16.xpose.msk.msra.mxu1 %vm4527_vm1, %v4110_v13 }
 0xac6   :  { %3928 = vmatmul.mubr.msk.f32.vlgmr.msra.gmra.mrb[14].mxu1 %vm77_vm0, %v1018_v15 }
 0xac7   :  { %3930 = vmatprep.mubr.msk.f32.mxu1 %vm77_vm0, %v1019_v18 }
 0xaca   :  { %3931 = vmatmul.mubr.msk.f32.gmra.mrb[16].mxu1 %vm77_vm0, %v1020_v19 }
 0xacb   :  { %3933 = vmatprep.mubr.msk.f32.mxu1 %vm77_vm0, %v1021_v22 }
 0xace   :  { %3934 = vmatmul.mubr.msk.f32.gmra.mrb[18].mxu1 %vm77_vm0, %v1022_v9 }
 0xacf   :  { %3936 = vmatprep.mubr.msk.f32.mxu1 %vm77_vm0, %v1023_v23 }
 0xad2   :  { %3937 = vmatmul.mubr.msk.f32.gmra.mrb[20].mxu1 %vm77_vm0, %v1024_v26 }
 0xb99   :  { %v3929_v27 = vpop.f32.mrb[14].mxu1 }
 0xb9a   :  { %v1165_v29 = vmul.f32 0.70710677, %v3929_v27  ;;  %v1125_v30 = vpop.f32.mrb[15].mxu1 }
 0xb9b   :  { %v1164_v32 = vmul.f32 0.70710677, %v1125_v30 }
 0xb9c   :  { %v1173_v33 = vadd.f32 %v1165_v29, %v4587_v31 }
 0xb9d   :  { %v3932_v35 = vpop.f32.mrb[16].mxu1  ;;  %v1172_v37 = vadd.f32 %v1164_v32, %v4592_v34 }
 0xb9e   :  { %v1167_v36 = vmul.f32 0.70710677, %v3932_v35  ;;  %v1135_v38 = vpop.f32.mrb[17].mxu1  ;;  %v1183_v1 = vsel %vm322_vm2, %v1173_v33, -inf }
 0xb9f   :  { %v1166_v2 = vmul.f32 0.70710677, %v1135_v38  ;;  %1184 = vmax.xlane.f32.xlu0 %v1183_v1  ;;  %v1180_v41 = vsel %vm322_vm2, %v1172_v37, -inf }
 0xba0   :  { %1181 = vmax.xlane.f32.xlu1 %v1180_v41  ;;  %v1175_v42 = vadd.f32 %v1167_v36, %v4599_v39 }
 0xba1   :  { %v3935_v43 = vpop.f32.mrb[18].mxu1  ;;  %v1174_v31 = vadd.f32 %v1166_v2, %v4606_v45 }
 0xba2   :  { %v1169_v40 = vmul.f32 0.70710677, %v3935_v43  ;;  %v1145_v44 = vpop.f32.mrb[19].mxu1  ;;  %v1189_v46 = vsel %vm322_vm2, %v1175_v42, -inf }
 0xba3   :  { %1190 = vmax.xlane.f32.xlu0 %v1189_v46  ;;  %v1168_v47 = vmul.f32 0.70710677, %v1145_v44  ;;  %v1186_v49 = vsel %vm322_vm2, %v1174_v31, -inf }
 0xba4   :  { %v1177_v50 = vadd.f32 %v1169_v40, %v4614_v52 }
 0xba5   :  { %v3938_v34 = vpop.f32.mrb[20].mxu1  ;;  %v1176_v39 = vadd.f32 %v1168_v47, %v4621_v58 }
 0xba6   :  { %v1155_v48 = vpop.f32.mrb[21].mxu1  ;;  %v1195_v53 = vsel %vm322_vm2, %v1177_v50, -inf  ;;  %v1171_v54 = vmul.f32 0.70710677, %v3938_v34 }
 0xba7   :  { %1187 = vmax.xlane.f32.xlu0 %v1186_v49  ;;  %v1170_v51 = vmul.f32 0.70710677, %v1155_v48  ;;  %v1192_v55 = vsel %vm322_vm2, %v1176_v39, -inf }
 0xba8   :  { %v1179_v59 = vadd.f32 %v1171_v54, %v4635_v4 }
 0xba9   :  { %v1178_v45 = vadd.f32 %v1170_v51, %v4628_v62 }
 0xbaa   :  { %v1201_v52 = vsel %vm322_vm2, %v1179_v59, -inf }
 0xbab   :  { %1196 = vmax.xlane.f32.xlu0 %v1195_v53  ;;  %v1198_v56 = vsel %vm322_vm2, %v1178_v45, -inf }
 0xbaf   :  { %1193 = vmax.xlane.f32.xlu0 %v1192_v55 }
 0xbb3   :  { %1199 = vmax.xlane.f32.xlu0 %v1198_v56 }
 0xbb7   :  { %1202 = vmax.xlane.f32.xlu0 %v1201_v52 }
 0xc2c   :  { %v1185_v61 = vpop.xlane.xlu0 %1184 }
 0xc2d   :  { %v1205_v63 = vsub.f32 %v1173_v33, %v1185_v61  ;;  %v1182_v0 = vpop.xlane.xlu1 %1181 }
 0xc2e   :  { %v1204_v3 = vsub.f32 %v1172_v37, %v1182_v0 }
 0xc2f   :  { %v1214_v58 = vmul.f32 1.442695, %v1205_v63 }
 0xc30   :  { %v1212_v5 = vmul.f32 1.442695, %v1204_v3  ;;  %v1191_v8 = vpop.xlane.xlu0 %1190 }
 0xc31   :  { %4249 = vpow2.f32 %v1214_v58  ;;  %v1207_v10 = vsub.f32 %v1175_v42, %v1191_v8 }
 0xc32   :  { %4251 = vpow2.f32 %v1212_v5 }
 0xc33   :  { %v1218_v62 = vmul.f32 1.442695, %v1207_v10 }
 0xc34   :  { %v1188_v11 = vpop.xlane.xlu0 %1187 }
 0xc35   :  { %4253 = vpow2.f32 %v1218_v62  ;;  %v1206_v12 = vsub.f32 %v1174_v31, %v1188_v11 }
 0xc37   :  { %v1216_v13 = vmul.f32 1.442695, %v1206_v12 }
 0xc38   :  { %v1197_v4 = vpop.xlane.xlu0 %1196 }
 0xc39   :  { %4255 = vpow2.f32 %v1216_v13  ;;  %v1209_v15 = vsub.f32 %v1177_v50, %v1197_v4 }
 0xc3b   :  { %v4775_v18 = vpop.eup %4249  ;;  %v1222_v19 = vmul.f32 1.442695, %v1209_v15 }
 0xc3c   :  { %v4252_v22 = vpop.eup %4251  ;;  %v1194_v9 = vpop.xlane.xlu0 %1193  ;;  %v1231_v23 = vsel %vm322_vm2, %v4775_v18, 0.0 }
 0xc3d   :  { %4257 = vpow2.f32 %v1222_v19  ;;  %v1208_v26 = vsub.f32 %v1176_v39, %v1194_v9  ;;  %1232 = vadd.xlane.f32.xlu1 %v1231_v23  ;;  %v1228_v27 = vsel %vm322_vm2, %v4252_v22, 0.0  ;;  %v3596_v19 = vld [vmem:[%s5237_s5 + $0x8] sm:$0xff] }
 0xc3e   :  { %1229 = vadd.xlane.f32.xlu0 %v1228_v27 }
 0xc3f   :  { %v4254_v29 = vpop.eup %4253  ;;  %v1220_v30 = vmul.f32 1.442695, %v1208_v26 }
 0xc40   :  { %v1200_v32 = vpop.xlane.xlu0 %1199  ;;  %v1237_v33 = vsel %vm322_vm2, %v4254_v29, 0.0 }
 0xc41   :  { %4259 = vpow2.f32 %v1220_v30  ;;  %v1210_v35 = vsub.f32 %v1178_v45, %v1200_v32  ;;  %1238 = vadd.xlane.f32.xlu1 %v1237_v33 }
 0xc43   :  { %v4256_v37 = vpop.eup %4255  ;;  %v1224_v36 = vmul.f32 1.442695, %v1210_v35 }
 0xc44   :  { %v1203_v38 = vpop.xlane.xlu0 %1202  ;;  %v1234_v1 = vsel %vm322_vm2, %v4256_v37, 0.0 }
 0xc45   :  { %4261 = vpow2.f32 %v1224_v36  ;;  %v1211_v2 = vsub.f32 %v1179_v59, %v1203_v38  ;;  %1235 = vadd.xlane.f32.xlu0 %v1234_v1 }
 0xc47   :  { %v4258_v41 = vpop.eup %4257  ;;  %v1226_v42 = vmul.f32 1.442695, %v1211_v2 }
 0xc48   :  { %v1243_v43 = vsel %vm322_vm2, %v4258_v41, 0.0 }
 0xc49   :  { %4263 = vpow2.f32 %v1226_v42  ;;  %1244 = vadd.xlane.f32.xlu1 %v1243_v43 }
 0xc4b   :  { %v4260_v40 = vpop.eup %4259 }
 0xc4c   :  { %v1240_v44 = vsel %vm322_vm2, %v4260_v40, 0.0 }
 0xc4d   :  { %1241 = vadd.xlane.f32.xlu0 %v1240_v44 }
 0xc4f   :  { %v4262_v46 = vpop.eup %4261 }
 0xc50   :  { %v1246_v31 = vsel %vm322_vm2, %v4262_v46, 0.0 }
 0xc51   :  { %1247 = vadd.xlane.f32.xlu0 %v1246_v31 }
 0xc53   :  { %v4264_v34 = vpop.eup %4263 }
 0xc54   :  { %v1249_v47 = vsel %vm322_vm2, %v4264_v34, 0.0 }
 0xc55   :  { %1250 = vadd.xlane.f32.xlu1 %v1249_v47 }
 0xc67   :  { %4185 = vrot.lane.b32.xlu0 %v4735_v6, %s4410_s28 }
 0xcca   :  { %v1233_v51 = vpop.xlane.xlu1 %1232 }
 0xccb   :  { %v1230_v48 = vpop.xlane.xlu0 %1229 }
 0xccc   :  { %4265 = vrcp.f32 %v1230_v48 }
 0xccd   :  { %4267 = vrcp.f32 %v1233_v51 }
 0xcce   :  { %v1239_v54 = vpop.xlane.xlu1 %1238 }
 0xcd2   :  { %v1236_v50 = vpop.xlane.xlu0 %1235 }
 0xcd3   :  { %4269 = vrcp.f32 %v1236_v50 }
 0xcd4   :  { %4271 = vrcp.f32 %v1239_v54 }
 0xcd6   :  { %v4266_v49 = vpop.eup %4265  ;;  %v1245_v45 = vpop.xlane.xlu1 %1244 }
 0xcd7   :  { %v1260_v53 = vmul.f32 %v4266_v49, %v4252_v22  ;;  %v4268_v63 = vpop.eup %4267 }
 0xcd8   :  { %v1261_v3 = vmul.f32 %v4268_v63, %v4775_v18 }
 0xcd9   :  { %3943 = vmatprep.mubr.msk.f32.mxu0 %vm322_vm2, %v1260_v53 }
 0xcda   :  { %v1242_v39 = vpop.xlane.xlu0 %1241 }
 0xcdb   :  { %4273 = vrcp.f32 %v1242_v39 }
 0xcdc   :  { %4275 = vrcp.f32 %v1245_v45  ;;  %v3610_v45 = vld [vmem:[%s5243_s11 + $0x20] sm:$0xff] }
 0xcdd   :  { %v4270_v0 = vpop.eup %4269 }
 0xcde   :  { %v1248_v55 = vpop.xlane.xlu0 %1247  ;;  %v4272_v58 = vpop.eup %4271  ;;  %v1262_v5 = vmul.f32 %v4270_v0, %v4256_v37 }
 0xcdf   :  { %4277 = vrcp.f32 %v1248_v55  ;;  %v1263_v10 = vmul.f32 %v4272_v58, %v4254_v29 }
 0xce2   :  { %v4186_v56 = vpop.permute.xlu0 %4185  ;;  %v1251_v6 = vpop.xlane.xlu1 %1250 }
 0xce3   :  { %v4188_v59 = vunpack.i.h.bf16 %v4186_v56  ;;  %v4187_v52 = vunpack.i.l.bf16 %v4186_v56  ;;  %4279 = vrcp.f32 %v1251_v6  ;;  %v3611_v56 = vld [vmem:[%s5243_s11 + $0x28] sm:$0xff] }
 0xce5   :  { %v4116_v61 = vpack.c.bf16 %v4188_v59, %v4187_v52  ;;  %v4274_v8 = vpop.eup %4273  ;;  %v4120_v59 = vpack.c.bf16 %v3611_v56, %v3610_v45 }
 0xce6   :  { %v4276_v62 = vpop.eup %4275  ;;  %v1264_v11 = vmul.f32 %v4274_v8, %v4260_v40 }
 0xce7   :  { %4117 = vmatprep.subr.bf16.mxu0 %v4116_v61  ;;  %v1265_v13 = vmul.f32 %v4276_v62, %v4258_v41 }
 0xce8   :  { %4119 = vmatpush3.bf16.msra.mxu0 %v4116_v61 }
 0xce9   :  { %v4278_v12 = vpop.eup %4277  ;;  %3955 = vmatprep.subr.mxu0 %v3596_v19 }
 0xcea   :  { %v1266_v15 = vmul.f32 %v4278_v12, %v4262_v46 }
 0xceb   :  { %3944 = vmatmul.mubr.msk.f32.vlgmr.msra.gmra.mrb[12].mxu0 %vm322_vm2, %v1261_v3 }
 0xcec   :  { %3946 = vmatprep.mubr.msk.f32.mxu0 %vm322_vm2, %v1262_v5  ;;  %3956 = vmatpush3.msra.mxu0 %v3596_v19  ;;  %v3603_v5 = vld [vmem:[%s5239_s7 + $0x1] ss:$0 sm:$0xff]  ;;  %v3613_v19 = vld [vmem:[%s5243_s11 + $0x38] sm:$0xff] }
 0xced   :  { %v4280_v4 = vpop.eup %4279  ;;  %4121 = vmatprep.subr.bf16.mxu0 %v4120_v59 }
 0xcee   :  { %v1267_v18 = vmul.f32 %v4280_v4, %v4264_v34 }
 0xcef   :  { %3947 = vmatmul.mubr.msk.f32.gmra.mrb[14].mxu0 %vm322_vm2, %v1263_v10  ;;  %v3604_v10 = vld [vmem:[%s5240_s8 + $0x1] ss:$0 sm:$0xff] }
 0xcf0   :  { %3949 = vmatprep.mubr.msk.f32.mxu0 %vm322_vm2, %v1264_v11 }
 0xcf3   :  { %3950 = vmatmul.mubr.msk.f32.gmra.mrb[16].mxu0 %vm322_vm2, %v1265_v13 }
 0xcf4   :  { %3952 = vmatprep.mubr.msk.f32.mxu0 %vm322_vm2, %v1266_v15 }
 0xcf7   :  { %3953 = vmatmul.mubr.msk.f32.gmra.mrb[18].mxu0 %vm322_vm2, %v1267_v18  ;;  %v3612_v18 = vld [vmem:[%s5243_s11 + $0x30] sm:$0xff] }
 0xdbe   :  { %v3945_v22 = vpop.f32.mrb[12].mxu0 }
 0xdbf   :  { %v1364_v9 = vpop.f32.mrb[13].mxu0  ;;  %v1404_v26 = vmul.f32 %v3945_v22, %v4538_v16  ;;  %v4124_v22 = vpack.c.bf16 %v3613_v19, %v3612_v18  ;;  %v4912_v19 = vld [vmem:[%s5234_s2 + $0x20] sm:$0xff] }
 0xdc0   :  { %v1403_v30 = vmul.f32 %v1364_v9, %v4517_v7  ;;  %v3607_v9 = vld [vmem:[%s5242_s10 + $0x1] ss:$0 sm:$0xff] }
 0xdc2   :  { %v3948_v23 = vpop.f32.mrb[14].mxu0 }
 0xdc3   :  { %v1406_v27 = vmul.f32 %v3948_v23, %v4550_v20  ;;  %v1374_v29 = vpop.f32.mrb[15].mxu0 }
 0xdc4   :  { %v1405_v32 = vmul.f32 %v1374_v29, %v4543_v17  ;;  %v3598_v17 = vld [vmem:[%s5238_s6 + $0x1] ss:$0 sm:$0xff] }
 0xdc5   :  { %v1412_v33 = vadd.f32 %v1406_v27, %v1404_v26 }
 0xdc6   :  { %v1411_v35 = vadd.f32 %v1405_v32, %v1403_v30  ;;  %v3951_v37 = vpop.f32.mrb[16].mxu0 }
 0xdc7   :  { %v1408_v36 = vmul.f32 %v3951_v37, %v4564_v24  ;;  %v1384_v38 = vpop.f32.mrb[17].mxu0 }
 0xdc8   :  { %v1407_v1 = vmul.f32 %v1384_v38, %v4556_v21 }
 0xdc9   :  { %v1414_v2 = vadd.f32 %v1412_v33, %v1408_v36  ;;  %v3615_v33 = vld [vmem:[%s5244_s12 + $0x1] ss:$0 sm:$0xff] }
 0xdca   :  { %v1413_v41 = vadd.f32 %v1411_v35, %v1407_v1  ;;  %v3954_v42 = vpop.f32.mrb[18].mxu0 }
 0xdcb   :  { %v1410_v16 = vmul.f32 %v3954_v42, %v4578_v28  ;;  %v1394_v43 = vpop.f32.mrb[19].mxu0 }
 0xdcc   :  { %v1409_v20 = vmul.f32 %v1394_v43, %v4570_v25 }
 0xdcd   :  { %v1416_v40 = vadd.f32 %v1414_v2, %v1410_v16 }
 0xdce   :  { %v1415_v7 = vadd.f32 %v1413_v41, %v1409_v20 }
 0xdd0   :  { %3957 = vmatprep.mubr.msk.f32.mxu0 %vm77_vm0, %v1415_v7 }
 0xdd1   :  { %3958 = vmatmul.mubr.msk.f32.vlgmr.msra.gmra.mrb[20].mxu0 %vm77_vm0, %v1416_v40 }
 0xdd2   :  { %4123 = vmatpush3.bf16.msra.mxu0 %v4120_v59  ;;  %v3624_v59 = vld [vmem:[%s5236_s4 + $0x2] ss:$0 sm:$0xff] }
 0xdd3   :  { %4125 = vmatprep.subr.bf16.mxu0 %v4124_v22 }
 0xdd6   :  { %4127 = vmatpush3.bf16.msra.mxu0 %v4124_v22 }
 0xea4   :  { %v3959_v24 = vpop.f32.mrb[20].mxu0 }
 0xea5   :  { %v1499_v21 = vpop.f32.mrb[21].mxu0  ;;  %v1505_v44 = vadd.f32 %v3959_v24, %v3598_v17 }
 0xea6   :  { %v1500_v46 = vadd.f32 %v3598_v17, %v1499_v21 }
 0xea7   :  { %v1509_v25 = vadd.f32 %v1505_v44, %v4728_v60  ;;  %v3605_v60 = vld [vmem:[%s5241_s9 + $0x8] sm:$0xff] }
 0xea8   :  { %v1508_v31 = vadd.f32 %v1500_v46, %v4724_v57  ;;  %3960 = vmatprep.subr.mxu1 %v3605_v60 }
 0xea9   :  { %v1517_v34 = vsel %vm77_vm0, %v1509_v25, 0.0  ;;  %3961 = vmatpush3.msra.mxu1 %v3605_v60 }
 0xeaa   :  { %v1514_v28 = vsel %vm77_vm0, %v1508_v31, 0.0 }
 0xeab   :  { %1515 = vadd.xlane.f32.xlu1 %v1514_v28 }
 0xeaf   :  { %1518 = vadd.xlane.f32.xlu1 %v1517_v34 }
 0xf38   :  { %v1516_v47 = vpop.xlane.xlu1 %1515 }
 0xf39   :  { %v1520_v48 = vmul.f32 0.125, %v1516_v47 }
 0xf3b   :  { %v1522_v49 = vsub.f32 %v1508_v31, %v1520_v48  ;;  %v3622_v31 = vld [vmem:[%s5235_s3 + $0x10] sm:$0xff] }
 0xf3c   :  { %v1519_v50 = vpop.xlane.xlu1 %1518  ;;  %3976 = vmatprep.subr.mxu1 %v3622_v31 }
 0xf3d   :  { %v1521_v51 = vmul.f32 0.125, %v1519_v50  ;;  %v1524_v53 = vmul.f32 %v1522_v49, %v1522_v49 }
 0xf3f   :  { %v1523_v39 = vsub.f32 %v1509_v25, %v1521_v51  ;;  %v1526_v54 = vsel %vm77_vm0, %v1524_v53, 0.0  ;;  %v3620_v51 = vld [vmem:[%s5245_s13 + $0x1] ss:$0 sm:$0xff] }
 0xf40   :  { %1527 = vadd.xlane.f32.xlu1 %v1526_v54 }
 0xf41   :  { %v1525_v55 = vmul.f32 %v1523_v39, %v1523_v39 }
 0xf43   :  { %v1529_v57 = vsel %vm77_vm0, %v1525_v55, 0.0 }
 0xf44   :  { %1530 = vadd.xlane.f32.xlu1 %v1529_v57 }
 0xfcd   :  { %v1528_v52 = vpop.xlane.xlu1 %1527 }
 0xfce   :  { %v1532_v6 = vmul.f32 0.125, %v1528_v52 }
 0xfd0   :  { %v1534_v61 = vadd.f32 1e-05, %v1532_v6 }
 0xfd1   :  { %v1531_v63 = vpop.xlane.xlu1 %1530 }
 0xfd2   :  { %4281 = vrsqrt.f32 %v1534_v61  ;;  %v1533_v0 = vmul.f32 0.125, %v1531_v63 }
 0xfd4   :  { %v1535_v3 = vadd.f32 1e-05, %v1533_v0 }
 0xfd6   :  { %4283 = vrsqrt.f32 %v1535_v3  ;;  %v4879_v3 = vld [vmem:[%s5234_s2] sm:$0xff] }
 0xfdc   :  { %v4282_v58 = vpop.eup %4281 }
 0xfdd   :  { %v1538_v8 = vmul.f32 %v4282_v58, %v1522_v49 }
 0xfdf   :  { %v1546_v62 = vmul.f32 %v3603_v5, %v1538_v8 }
 0xfe0   :  { %v4284_v11 = vpop.eup %4283 }
 0xfe1   :  { %v1539_v12 = vmul.f32 %v4284_v11, %v1523_v39  ;;  %v1554_v13 = vadd.f32 %v3604_v10, %v1546_v62  ;;  %v3621_v39 = vld [vmem:[%s5246_s14 + $0x1] ss:$0 sm:$0xff]  ;;  %v4892_v11 = vld [vmem:[%s5234_s2 + $0x8] sm:$0xff] }
 0xfe3   :  { %v1547_v4 = vmul.f32 %v3603_v5, %v1539_v12  ;;  %3962 = vmatprep.mubr.msk.f32.mxu1 %vm77_vm0, %v1554_v13 }
 0xfe5   :  { %v1555_v15 = vadd.f32 %v3604_v10, %v1547_v4 }
 0xfe7   :  { %3963 = vmatmul.mubr.msk.f32.vlgmr.msra.gmra.mrb[22].mxu1 %vm77_vm0, %v1555_v15 }
 0xfe8   :  { %3977 = vmatpush3.msra.mxu1 %v3622_v31  ;;  %v4962_v31 = vld [vmem:[%s5233_s1 + $0x10] sm:$0xff] }
0x10ba   :  { %v3964_v23 = vpop.f32.mrb[22].mxu1 }
0x10bb   :  { %v1644_v26 = vadd.f32 %v3964_v23, %v3607_v9  ;;  %v1638_v27 = vpop.f32.mrb[23].mxu1 }
0x10bc   :  { %v1639_v29 = vadd.f32 %v3607_v9, %v1638_v27  ;;  %v4920_v9 = vld [vmem:[%s5234_s2 + $0x28] sm:$0xff] }
0x10bd   :  { %v1648_v32 = vmax.f32 %v1644_v26, 0.0  ;;  %v4926_v26 = vld [vmem:[%s5234_s2 + $0x30] sm:$0xff] }
0x10be   :  { %v1647_v30 = vmax.f32 %v1639_v29, 0.0  ;;  %v4934_v29 = vld [vmem:[%s5234_s2 + $0x38] sm:$0xff] }
0x10c0   :  { %3973 = vmatprep.mubr.msk.f32.mxu0 %vm798_vm3, %v1647_v30 }
0x10c1   :  { %3974 = vmatmul.mubr.msk.f32.vlgmr.msra.gmra.mrb[22].mxu0 %vm798_vm3, %v1648_v32 }
0x1194   :  { %v3975_v35 = vpop.f32.mrb[22].mxu0 }
0x1195   :  { %v1734_v37 = vpop.f32.mrb[23].mxu0  ;;  %v1740_v36 = vadd.f32 %v3975_v35, %v3615_v33 }
0x1196   :  { %v1735_v38 = vadd.f32 %v3615_v33, %v1734_v37 }
0x1197   :  { %v1744_v41 = vadd.f32 %v1740_v36, %v1555_v15  ;;  %v4906_v15 = vld [vmem:[%s5234_s2 + $0x18] sm:$0xff]  ;;  %v4941_v36 = vld [vmem:[%s5233_s1 + $0x8] sm:$0xff] }
0x1198   :  { %v1743_v1 = vadd.f32 %v1735_v38, %v1554_v13  ;;  %v4898_v13 = vld [vmem:[%s5234_s2 + $0x10] sm:$0xff] }
0x1199   :  { %v1752_v42 = vsel %vm77_vm0, %v1744_v41, 0.0 }
0x119a   :  { %v1749_v2 = vsel %vm77_vm0, %v1743_v1, 0.0 }
0x119b   :  { %1750 = vadd.xlane.f32.xlu1 %v1749_v2  ;;  %v4947_v2 = vld [vmem:[%s5233_s1] sm:$0xff] }
0x119f   :  { %1753 = vadd.xlane.f32.xlu1 %v1752_v42 }
0x1228   :  { %v1751_v16 = vpop.xlane.xlu1 %1750 }
0x1229   :  { %v1755_v43 = vmul.f32 0.125, %v1751_v16 }
0x122b   :  { %v1757_v20 = vsub.f32 %v1743_v1, %v1755_v43 }
0x122c   :  { %v1754_v40 = vpop.xlane.xlu1 %1753 }
0x122d   :  { %v1756_v7 = vmul.f32 0.125, %v1754_v40  ;;  %v1759_v17 = vmul.f32 %v1757_v20, %v1757_v20 }
0x122f   :  { %v1758_v24 = vsub.f32 %v1744_v41, %v1756_v7  ;;  %v1761_v21 = vsel %vm77_vm0, %v1759_v17, 0.0  ;;  %v4955_v7 = vld [vmem:[%s5233_s1 + $0x18] sm:$0xff] }
0x1230   :  { %1762 = vadd.xlane.f32.xlu0 %v1761_v21 }
0x1231   :  { %v1760_v44 = vmul.f32 %v1758_v24, %v1758_v24 }
0x1233   :  { %v1764_v46 = vsel %vm77_vm0, %v1760_v44, 0.0 }
0x1234   :  { %1765 = vadd.xlane.f32.xlu1 %v1764_v46 }
0x12bd   :  { %v1763_v28 = vpop.xlane.xlu0 %1762 }
0x12be   :  { %v1767_v25 = vmul.f32 0.125, %v1763_v28 }
0x12c0   :  { %v1769_v34 = vadd.f32 1e-05, %v1767_v25 }
0x12c1   :  { %v1766_v47 = vpop.xlane.xlu1 %1765 }
0x12c2   :  { %4285 = vrsqrt.f32 %v1769_v34  ;;  %v1768_v48 = vmul.f32 0.125, %v1766_v47 }
0x12c4   :  { %v1770_v49 = vadd.f32 1e-05, %v1768_v48 }
0x12c6   :  { %4287 = vrsqrt.f32 %v1770_v49  ;;  %v4969_v49 = vld [vmem:[%s5233_s1 + $0x28] sm:$0xff] }
0x12cc   :  { %v4286_v50 = vpop.eup %4285 }
0x12cd   :  { %v1773_v53 = vmul.f32 %v4286_v50, %v1757_v20 }
0x12cf   :  { %v1781_v54 = vmul.f32 %v3620_v51, %v1773_v53 }
0x12d0   :  { %v4288_v55 = vpop.eup %4287 }
0x12d1   :  { %v1774_v57 = vmul.f32 %v4288_v55, %v1758_v24  ;;  %v4863_v60 = vadd.f32 %v3621_v39, %v1781_v54 }
0x12d3   :  { %v1782_v45 = vmul.f32 %v3620_v51, %v1774_v57  ;;  %3978 = vmatprep.mubr.msk.f32.mxu1 %vm77_vm0, %v4863_v60 }
0x12d5   :  { %v4867_v56 = vadd.f32 %v3621_v39, %v1782_v45  ;;  %v4976_v39 = vld [vmem:[%s5233_s1 + $0x20] sm:$0xff]  ;;  %v4983_v45 = vld [vmem:[%s5233_s1 + $0x30] sm:$0xff] }
0x12d7   :  { %3979 = vmatmul.mubr.msk.f32.vlgmr.msra.gmra.mrb[24].mxu1 %vm77_vm0, %v4867_v56 }
0x13aa   :  { %v3980_v52 = vpop.f32.mrb[24].mxu1 }
0x13ab   :  { %v1879_v6 = vadd.f32 %v3980_v52, %v3624_v59  ;;  %v1873_v61 = vpop.f32.mrb[25].mxu1 }
0x13ac   :  { %v1874_v63 = vadd.f32 %v3624_v59, %v1873_v61 }
0x13ad   :  { %v1883_v12 = vmul.f32 %v4892_v11, %v1879_v6  ;;  %v1885_v18 = vmul.f32 %v4906_v15, %v1879_v6  ;;  %v1887_v23 = vmul.f32 %v4920_v9, %v1879_v6  ;;  %v1889_v30 = vmul.f32 %v4934_v29, %v1879_v6 }
0x13ae   :  { %v4874_v0 = vpack.i.bf16 %v1879_v6, %v1874_v63  ;;  %v1882_v58 = vmul.f32 %v4879_v3, %v1874_v63  ;;  %v1884_v4 = vmul.f32 %v4898_v13, %v1874_v63  ;;  %v1886_v22 = vmul.f32 %v4912_v19, %v1874_v63  ;;  %v4990_v6 = vld [vmem:[%s5233_s1 + $0x38] sm:$0xff] }
0x13af   :  { %v1888_v27 = vmul.f32 %v4926_v26, %v1874_v63 }
0x13b0   :  { %4190 = vrot.lane.b32.xlu1 %v4874_v0, %s4409_s0  ;;  %3985 = vmatprep.mubr.msk.f32.mxu1 %vm77_vm0, %v1882_v58 }
0x1422   :  { %v4191_v5 = vpop.permute.xlu1 %4190 }
0x1423   :  { %v4193_v8 = vunpack.i.h.bf16 %v4191_v5  ;;  %v4192_v10 = vunpack.i.l.bf16 %v4191_v5 }
0x1425   :  { %v4128_v62 = vpack.c.bf16 %v4193_v8, %v4192_v10 }
0x1427   :  { %4130 = vmatprep.subr.msk.bf16.mxu1 %vm4527_vm1, %v4128_v62 }
0x1428   :  { %4133 = vmatpush3.bf16.xpose.msk.msra.mxu1 %vm4527_vm1, %v4128_v62 }
0x142f   :  { %3986 = vmatmul.mubr.msk.f32.vlgmr.msra.gmra.mrb[26].mxu1 %vm77_vm0, %v1883_v12 }
0x1430   :  { %3988 = vmatprep.mubr.msk.f32.mxu1 %vm77_vm0, %v1884_v4 }
0x1433   :  { %3989 = vmatmul.mubr.msk.f32.gmra.mrb[28].mxu1 %vm77_vm0, %v1885_v18 }
0x1434   :  { %3991 = vmatprep.mubr.msk.f32.mxu1 %vm77_vm0, %v1886_v22 }
0x1437   :  { %3992 = vmatmul.mubr.msk.f32.gmra.mrb[30].mxu1 %vm77_vm0, %v1887_v23 }
0x1438   :  { %3994 = vmatprep.mubr.msk.f32.mxu1 %vm77_vm0, %v1888_v27 }
0x143b   :  { %3995 = vmatmul.mubr.msk.f32.gmra.mrb[32].mxu1 %vm77_vm0, %v1889_v30 }
0x1502   :  { %v3987_v32 = vpop.f32.mrb[26].mxu1 }
0x1503   :  { %v2030_v33 = vmul.f32 0.70710677, %v3987_v32  ;;  %v1990_v35 = vpop.f32.mrb[27].mxu1 }
0x1504   :  { %v2029_v37 = vmul.f32 0.70710677, %v1990_v35 }
0x1505   :  { %v2038_v38 = vadd.f32 %v4941_v36, %v2030_v33 }
0x1506   :  { %v3990_v1 = vpop.f32.mrb[28].mxu1  ;;  %v2037_v41 = vadd.f32 %v4947_v2, %v2029_v37 }
0x1507   :  { %v2032_v42 = vmul.f32 0.70710677, %v3990_v1  ;;  %v2000_v16 = vpop.f32.mrb[29].mxu1  ;;  %v2048_v43 = vsel %vm322_vm2, %v2038_v38, -inf }
0x1508   :  { %v2031_v20 = vmul.f32 0.70710677, %v2000_v16  ;;  %2049 = vmax.xlane.f32.xlu0 %v2048_v43  ;;  %v2045_v40 = vsel %vm322_vm2, %v2037_v41, -inf }
0x1509   :  { %2046 = vmax.xlane.f32.xlu1 %v2045_v40  ;;  %v2040_v17 = vadd.f32 %v4955_v7, %v2032_v42 }
0x150a   :  { %v3993_v24 = vpop.f32.mrb[30].mxu1  ;;  %v2039_v28 = vadd.f32 %v4962_v31, %v2031_v20 }
0x150b   :  { %v2034_v21 = vmul.f32 0.70710677, %v3993_v24  ;;  %v2010_v44 = vpop.f32.mrb[31].mxu1  ;;  %v2054_v46 = vsel %vm322_vm2, %v2040_v17, -inf }
0x150c   :  { %2055 = vmax.xlane.f32.xlu0 %v2054_v46  ;;  %v2033_v34 = vmul.f32 0.70710677, %v2010_v44  ;;  %v2051_v48 = vsel %vm322_vm2, %v2039_v28, -inf }
0x150d   :  { %v2042_v50 = vadd.f32 %v4969_v49, %v2034_v21 }
0x150e   :  { %v3996_v25 = vpop.f32.mrb[32].mxu1  ;;  %v2041_v54 = vadd.f32 %v4976_v39, %v2033_v34 }
0x150f   :  { %v2020_v47 = vpop.f32.mrb[33].mxu1  ;;  %v2060_v53 = vsel %vm322_vm2, %v2042_v50, -inf  ;;  %v2036_v55 = vmul.f32 0.70710677, %v3996_v25 }
0x1510   :  { %2052 = vmax.xlane.f32.xlu0 %v2051_v48  ;;  %v2035_v51 = vmul.f32 0.70710677, %v2020_v47  ;;  %v2057_v57 = vsel %vm322_vm2, %v2041_v54, -inf }
0x1511   :  { %v2044_v61 = vadd.f32 %v4990_v6, %v2036_v55 }
0x1512   :  { %v2043_v59 = vadd.f32 %v4983_v45, %v2035_v51 }
0x1513   :  { %v2066_v63 = vsel %vm322_vm2, %v2044_v61, -inf }
0x1514   :  { %2061 = vmax.xlane.f32.xlu0 %v2060_v53  ;;  %v2063_v52 = vsel %vm322_vm2, %v2043_v59, -inf }
0x1518   :  { %2058 = vmax.xlane.f32.xlu0 %v2057_v57 }
0x151c   :  { %2064 = vmax.xlane.f32.xlu0 %v2063_v52 }
0x1520   :  { %2067 = vmax.xlane.f32.xlu0 %v2066_v63 }
0x1595   :  { %v2050_v58 = vpop.xlane.xlu0 %2049 }
0x1596   :  { %v2070_v5 = vsub.f32 %v2038_v38, %v2050_v58  ;;  %v2047_v8 = vpop.xlane.xlu1 %2046 }
0x1597   :  { %v2069_v10 = vsub.f32 %v2037_v41, %v2047_v8 }
0x1598   :  { %v2079_v62 = vmul.f32 1.442695, %v2070_v5 }
0x1599   :  { %v2077_v12 = vmul.f32 1.442695, %v2069_v10  ;;  %v2056_v4 = vpop.xlane.xlu0 %2055 }
0x159a   :  { %4289 = vpow2.f32 %v2079_v62  ;;  %v2072_v18 = vsub.f32 %v2040_v17, %v2056_v4 }
0x159b   :  { %4291 = vpow2.f32 %v2077_v12 }
0x159c   :  { %v2083_v22 = vmul.f32 1.442695, %v2072_v18 }
0x159d   :  { %v2053_v23 = vpop.xlane.xlu0 %2052 }
0x159e   :  { %4293 = vpow2.f32 %v2083_v22  ;;  %v2071_v27 = vsub.f32 %v2039_v28, %v2053_v23 }
0x15a0   :  { %v2081_v30 = vmul.f32 1.442695, %v2071_v27 }
0x15a1   :  { %v2062_v32 = vpop.xlane.xlu0 %2061 }
0x15a2   :  { %4295 = vpow2.f32 %v2081_v30  ;;  %v2074_v33 = vsub.f32 %v2042_v50, %v2062_v32 }
0x15a4   :  { %v4994_v35 = vpop.eup %4289  ;;  %v2087_v37 = vmul.f32 1.442695, %v2074_v33 }
0x15a5   :  { %v4292_v38 = vpop.eup %4291  ;;  %v2059_v1 = vpop.xlane.xlu0 %2058  ;;  %v2096_v41 = vsel %vm322_vm2, %v4994_v35, 0.0 }
0x15a6   :  { %4297 = vpow2.f32 %v2087_v37  ;;  %v2073_v42 = vsub.f32 %v2041_v54, %v2059_v1  ;;  %2097 = vadd.xlane.f32.xlu1 %v2096_v41  ;;  %v2093_v16 = vsel %vm322_vm2, %v4292_v38, 0.0 }
0x15a7   :  { %2094 = vadd.xlane.f32.xlu0 %v2093_v16 }
0x15a8   :  { %v4294_v43 = vpop.eup %4293  ;;  %v2085_v20 = vmul.f32 1.442695, %v2073_v42 }
0x15a9   :  { %v2065_v40 = vpop.xlane.xlu0 %2064  ;;  %v2102_v17 = vsel %vm322_vm2, %v4294_v43, 0.0 }
0x15aa   :  { %4299 = vpow2.f32 %v2085_v20  ;;  %v2075_v24 = vsub.f32 %v2043_v59, %v2065_v40  ;;  %2103 = vadd.xlane.f32.xlu1 %v2102_v17 }
0x15ac   :  { %v4296_v21 = vpop.eup %4295  ;;  %v2089_v44 = vmul.f32 1.442695, %v2075_v24 }
0x15ad   :  { %v2068_v46 = vpop.xlane.xlu0 %2067  ;;  %v2099_v28 = vsel %vm322_vm2, %v4296_v21, 0.0 }
0x15ae   :  { %4301 = vpow2.f32 %v2089_v44  ;;  %v2076_v25 = vsub.f32 %v2044_v61, %v2068_v46  ;;  %2100 = vadd.xlane.f32.xlu0 %v2099_v28 }
0x15b0   :  { %v4298_v34 = vpop.eup %4297  ;;  %v2091_v47 = vmul.f32 1.442695, %v2076_v25 }
0x15b1   :  { %v2108_v48 = vsel %vm322_vm2, %v4298_v34, 0.0 }
0x15b2   :  { %4303 = vpow2.f32 %v2091_v47  ;;  %2109 = vadd.xlane.f32.xlu1 %v2108_v48 }
0x15b4   :  { %v4300_v50 = vpop.eup %4299 }
0x15b5   :  { %v2105_v51 = vsel %vm322_vm2, %v4300_v50, 0.0 }
0x15b6   :  { %2106 = vadd.xlane.f32.xlu0 %v2105_v51 }
0x15b8   :  { %v4302_v53 = vpop.eup %4301 }
0x15b9   :  { %v2111_v54 = vsel %vm322_vm2, %v4302_v53, 0.0 }
0x15ba   :  { %2112 = vadd.xlane.f32.xlu0 %v2111_v54 }
0x15bc   :  { %v4304_v55 = vpop.eup %4303 }
0x15bd   :  { %v2114_v57 = vsel %vm322_vm2, %v4304_v55, 0.0 }
0x15be   :  { %2115 = vadd.xlane.f32.xlu1 %v2114_v57 }
0x15d0   :  { %4195 = vrot.lane.b32.xlu0 %v4874_v0, %s4410_s28 }
0x1633   :  { %v2098_v63 = vpop.xlane.xlu1 %2097 }
0x1634   :  { %v2095_v59 = vpop.xlane.xlu0 %2094 }
0x1635   :  { %4305 = vrcp.f32 %v2095_v59 }
0x1636   :  { %4307 = vrcp.f32 %v2098_v63 }
0x1637   :  { %v2104_v8 = vpop.xlane.xlu1 %2103 }
0x163b   :  { %v2101_v61 = vpop.xlane.xlu0 %2100 }
0x163c   :  { %4309 = vrcp.f32 %v2101_v61 }
0x163d   :  { %4311 = vrcp.f32 %v2104_v8  ;;  %v3647_v8 = vld [vmem:[%s5238_s6 + $0x2] ss:$0 sm:$0xff] }
0x163f   :  { %v4306_v52 = vpop.eup %4305  ;;  %v2110_v62 = vpop.xlane.xlu1 %2109 }
0x1640   :  { %v2125_v58 = vmul.f32 %v4306_v52, %v4292_v38  ;;  %v4308_v23 = vpop.eup %4307 }
0x1641   :  { %v2126_v30 = vmul.f32 %v4308_v23, %v4994_v35 }
0x1642   :  { %4001 = vmatprep.mubr.msk.f32.mxu0 %vm322_vm2, %v2125_v58 }
0x1643   :  { %v2107_v5 = vpop.xlane.xlu0 %2106 }
0x1644   :  { %4313 = vrcp.f32 %v2107_v5 }
0x1645   :  { %4315 = vrcp.f32 %v2110_v62 }
0x1646   :  { %v4310_v27 = vpop.eup %4309 }
0x1647   :  { %v2113_v10 = vpop.xlane.xlu0 %2112  ;;  %v4312_v32 = vpop.eup %4311  ;;  %v2127_v33 = vmul.f32 %v4310_v27, %v4296_v21 }
0x1648   :  { %4317 = vrcp.f32 %v2113_v10  ;;  %v2128_v38 = vmul.f32 %v4312_v32, %v4294_v43  ;;  %v3645_v43 = vld [vmem:[%s5237_s5 + $0x10] sm:$0xff] }
0x164b   :  { %v4196_v12 = vpop.permute.xlu0 %4195  ;;  %v2116_v0 = vpop.xlane.xlu1 %2115 }
0x164c   :  { %v4198_v4 = vunpack.i.h.bf16 %v4196_v12  ;;  %v4197_v18 = vunpack.i.l.bf16 %v4196_v12  ;;  %4319 = vrcp.f32 %v2116_v0 }
0x164e   :  { %v4134_v22 = vpack.c.bf16 %v4198_v4, %v4197_v18  ;;  %v4314_v37 = vpop.eup %4313 }
0x164f   :  { %v4316_v1 = vpop.eup %4315  ;;  %v2129_v41 = vmul.f32 %v4314_v37, %v4300_v50 }
0x1650   :  { %4135 = vmatprep.subr.bf16.mxu0 %v4134_v22  ;;  %v2130_v16 = vmul.f32 %v4316_v1, %v4298_v34 }
0x1651   :  { %4137 = vmatpush3.bf16.msra.mxu0 %v4134_v22 }
0x1652   :  { %v4318_v42 = vpop.eup %4317  ;;  %4013 = vmatprep.subr.mxu0 %v3645_v43 }
0x1653   :  { %v2131_v40 = vmul.f32 %v4318_v42, %v4302_v53 }
0x1654   :  { %4002 = vmatmul.mubr.msk.f32.vlgmr.msra.gmra.mrb[24].mxu0 %vm322_vm2, %v2126_v30 }
0x1655   :  { %4004 = vmatprep.mubr.msk.f32.mxu0 %vm322_vm2, %v2127_v33  ;;  %4014 = vmatpush3.msra.mxu0 %v3645_v43 }
0x1656   :  { %v4320_v20 = vpop.eup %4319 }
0x1657   :  { %v2132_v35 = vmul.f32 %v4320_v20, %v4304_v55  ;;  %v3660_v20 = vld [vmem:[%s5243_s11 + $0x48] sm:$0xff] }
0x1658   :  { %4005 = vmatmul.mubr.msk.f32.gmra.mrb[26].mxu0 %vm322_vm2, %v2128_v38 }
0x1659   :  { %4007 = vmatprep.mubr.msk.f32.mxu0 %vm322_vm2, %v2129_v41 }
0x165c   :  { %4008 = vmatmul.mubr.msk.f32.gmra.mrb[28].mxu0 %vm322_vm2, %v2130_v16  ;;  %v3659_v16 = vld [vmem:[%s5243_s11 + $0x40] sm:$0xff] }
0x165d   :  { %4010 = vmatprep.mubr.msk.f32.mxu0 %vm322_vm2, %v2131_v40  ;;  %v4138_v40 = vpack.c.bf16 %v3660_v20, %v3659_v16  ;;  %v3671_v20 = vld [vmem:[%s5235_s3 + $0x18] sm:$0xff]  ;;  %s4411_s3 = smov [#allocation2]  }
0x165e   :  { %s3528_s17 = sshll.u32 %s4411_s3, 4  ;;  %s3529_s17 = int_to_ptr.vmem [resolvable:$true] %s3528_s17 }
0x165f   :  { %4139 = vmatprep.subr.bf16.mxu0 %v4138_v40  ;;  %p4390_p1 = scmp.lt.s32.totalorder %s3529_s17, %s3529_s17 }
0x1660   :  { %4011 = vmatmul.mubr.msk.f32.gmra.mrb[30].mxu0 %vm322_vm2, %v2132_v35 }
0x1727   :  { %v4003_v17 = vpop.f32.mrb[24].mxu0 }
0x1728   :  { %v2229_v24 = vpop.f32.mrb[25].mxu0  ;;  %v2269_v44 = vmul.f32 %v4892_v11, %v4003_v17 }
0x1729   :  { %v2268_v25 = vmul.f32 %v4879_v3, %v2229_v24 }
0x172b   :  { %v4006_v21 = vpop.f32.mrb[26].mxu0 }
0x172c   :  { %v2271_v46 = vmul.f32 %v4906_v15, %v4006_v21  ;;  %v2239_v28 = vpop.f32.mrb[27].mxu0 }
0x172d   :  { %v2270_v34 = vmul.f32 %v4898_v13, %v2239_v28  ;;  %v3652_v28 = vld [vmem:[%s5239_s7 + $0x2] ss:$0 sm:$0xff] }
0x172e   :  { %v2277_v47 = vadd.f32 %v2271_v46, %v2269_v44 }
0x172f   :  { %v2276_v48 = vadd.f32 %v2270_v34, %v2268_v25  ;;  %v4009_v50 = vpop.f32.mrb[28].mxu0  ;;  %v3653_v34 = vld [vmem:[%s5240_s8 + $0x2] ss:$0 sm:$0xff] }
0x1730   :  { %v2273_v51 = vmul.f32 %v4920_v9, %v4009_v50  ;;  %v2249_v53 = vpop.f32.mrb[29].mxu0 }
0x1731   :  { %v2272_v54 = vmul.f32 %v4912_v19, %v2249_v53 }
0x1732   :  { %v2279_v55 = vadd.f32 %v2277_v47, %v2273_v51 }
0x1733   :  { %v2278_v57 = vadd.f32 %v2276_v48, %v2272_v54  ;;  %v4012_v59 = vpop.f32.mrb[30].mxu0 }
0x1734   :  { %v2275_v52 = vmul.f32 %v4934_v29, %v4012_v59  ;;  %v2259_v61 = vpop.f32.mrb[31].mxu0 }
0x1735   :  { %v2274_v63 = vmul.f32 %v4926_v26, %v2259_v61 }
0x1736   :  { %v2281_v58 = vadd.f32 %v2279_v55, %v2275_v52  ;;  %v3661_v55 = vld [vmem:[%s5243_s11 + $0x50] sm:$0xff]  ;;  %v3656_v52 = vld [vmem:[%s5242_s10 + $0x2] ss:$0 sm:$0xff] }
0x1737   :  { %v2280_v5 = vadd.f32 %v2278_v57, %v2274_v63  ;;  %v3662_v57 = vld [vmem:[%s5243_s11 + $0x58] sm:$0xff] }
0x1738   :  { %v4142_v59 = vpack.c.bf16 %v3662_v57, %v3661_v55 }
0x1739   :  { %4015 = vmatprep.mubr.msk.f32.mxu0 %vm77_vm0, %v2280_v5 }
0x173a   :  { %4016 = vmatmul.mubr.msk.f32.vlgmr.msra.gmra.mrb[32].mxu0 %vm77_vm0, %v2281_v58 }
0x173b   :  { %4141 = vmatpush3.bf16.msra.mxu0 %v4138_v40 }
0x173c   :  { %4143 = vmatprep.subr.bf16.mxu0 %v4142_v59 }
0x173f   :  { %4145 = vmatpush3.bf16.msra.mxu0 %v4142_v59 }
0x180d   :  { %v4017_v10 = vpop.f32.mrb[32].mxu0 }
0x180e   :  { %v2364_v62 = vpop.f32.mrb[33].mxu0  ;;  %v2370_v12 = vadd.f32 %v4017_v10, %v3647_v8 }
0x180f   :  { %v2365_v4 = vadd.f32 %v3647_v8, %v2364_v62  ;;  %v3664_v62 = vld [vmem:[%s5244_s12 + $0x2] ss:$0 sm:$0xff] }
0x1810   :  { %v2374_v22 = vadd.f32 %v2370_v12, %v4867_v56  ;;  %v3654_v56 = vld [vmem:[%s5241_s9 + $0x10] sm:$0xff] }
0x1811   :  { %v2373_v18 = vadd.f32 %v2365_v4, %v4863_v60  ;;  %4018 = vmatprep.subr.mxu1 %v3654_v56 }
0x1812   :  { %v2382_v23 = vsel %vm77_vm0, %v2374_v22, 0.0  ;;  %4019 = vmatpush3.msra.mxu1 %v3654_v56 }
0x1813   :  { %v2379_v0 = vsel %vm77_vm0, %v2373_v18, 0.0  ;;  %4034 = vmatprep.subr.mxu1 %v3671_v20 }
0x1814   :  { %2380 = vadd.xlane.f32.xlu1 %v2379_v0 }
0x1818   :  { %2383 = vadd.xlane.f32.xlu1 %v2382_v23 }
0x18a1   :  { %v2381_v27 = vpop.xlane.xlu1 %2380 }
0x18a2   :  { %v2385_v30 = vmul.f32 0.125, %v2381_v27 }
0x18a4   :  { %v2387_v32 = vsub.f32 %v2373_v18, %v2385_v30 }
0x18a5   :  { %v2384_v33 = vpop.xlane.xlu1 %2383 }
0x18a6   :  { %v2386_v37 = vmul.f32 0.125, %v2384_v33  ;;  %v2389_v38 = vmul.f32 %v2387_v32, %v2387_v32 }
0x18a8   :  { %v2388_v1 = vsub.f32 %v2374_v22, %v2386_v37  ;;  %v2391_v41 = vsel %vm77_vm0, %v2389_v38, 0.0 }
0x18a9   :  { %2392 = vadd.xlane.f32.xlu1 %v2391_v41 }
0x18aa   :  { %v2390_v42 = vmul.f32 %v2388_v1, %v2388_v1 }
0x18ac   :  { %v2394_v60 = vsel %vm77_vm0, %v2390_v42, 0.0 }
0x18ad   :  { %2395 = vadd.xlane.f32.xlu1 %v2394_v60 }
0x1936   :  { %v2393_v35 = vpop.xlane.xlu1 %2392 }
0x1937   :  { %v2397_v43 = vmul.f32 0.125, %v2393_v35 }
0x1939   :  { %v2399_v17 = vadd.f32 1e-05, %v2397_v43 }
0x193a   :  { %v2396_v24 = vpop.xlane.xlu1 %2395 }
0x193b   :  { %4321 = vrsqrt.f32 %v2399_v17  ;;  %v2398_v21 = vmul.f32 0.125, %v2396_v24 }
0x193d   :  { %v2400_v44 = vadd.f32 1e-05, %v2398_v21 }
0x193f   :  { %4323 = vrsqrt.f32 %v2400_v44 }
0x1945   :  { %v4322_v46 = vpop.eup %4321 }
0x1946   :  { %v2403_v25 = vmul.f32 %v4322_v46, %v2387_v32  ;;  %v3669_v46 = vld [vmem:[%s5245_s13 + $0x2] ss:$0 sm:$0xff] }
0x1948   :  { %v2411_v47 = vmul.f32 %v3652_v28, %v2403_v25  ;;  %v3670_v25 = vld [vmem:[%s5246_s14 + $0x2] ss:$0 sm:$0xff] }
0x1949   :  { %v4324_v48 = vpop.eup %4323 }
0x194a   :  { %v2404_v50 = vmul.f32 %v4324_v48, %v2388_v1  ;;  %v2419_v51 = vadd.f32 %v3653_v34, %v2411_v47 }
0x194c   :  { %v2412_v53 = vmul.f32 %v3652_v28, %v2404_v50  ;;  %4020 = vmatprep.mubr.msk.f32.mxu1 %vm77_vm0, %v2419_v51 }
0x194e   :  { %v2420_v54 = vadd.f32 %v3653_v34, %v2412_v53 }
0x1950   :  { %4021 = vmatmul.mubr.msk.f32.vlgmr.msra.gmra.mrb[34].mxu1 %vm77_vm0, %v2420_v54 }
0x1951   :  { %4035 = vmatpush3.msra.mxu1 %v3671_v20 }
0x1a23   :  { %v4022_v61 = vpop.f32.mrb[34].mxu1 }
0x1a24   :  { %v2509_v63 = vadd.f32 %v4022_v61, %v3656_v52  ;;  %v2503_v58 = vpop.f32.mrb[35].mxu1 }
0x1a25   :  { %v2504_v5 = vadd.f32 %v3656_v52, %v2503_v58 }
0x1a26   :  { %v2513_v10 = vmax.f32 %v2509_v63, 0.0 }
0x1a27   :  { %v2512_v8 = vmax.f32 %v2504_v5, 0.0 }
0x1a29   :  { %4031 = vmatprep.mubr.msk.f32.mxu0 %vm798_vm3, %v2512_v8 }
0x1a2a   :  { %4032 = vmatmul.mubr.msk.f32.vlgmr.msra.gmra.mrb[34].mxu0 %vm798_vm3, %v2513_v10 }
0x1afd   :  { %v4033_v12 = vpop.f32.mrb[34].mxu0 }
0x1afe   :  { %v2599_v4 = vpop.f32.mrb[35].mxu0  ;;  %v2605_v18 = vadd.f32 %v4033_v12, %v3664_v62 }
0x1aff   :  { %v2600_v0 = vadd.f32 %v3664_v62, %v2599_v4 }
0x1b00   :  { %v2609_v27 = vadd.f32 %v2605_v18, %v2420_v54  ;;  %v3673_v54 = vld [vmem:[%s5236_s4 + $0x3] ss:$0 sm:$0xff]  ;;  %s4385_s4 = scalar_lea.vmem %s3529_s17, 256 }
0x1b01   :  { %v2608_v22 = vadd.f32 %v2600_v0, %v2419_v51  ;;  %p4386_p0 = scmp.ne.s32.totalorder %s3529_s17, %s4385_s4  ;;  %p4391_p2 = scmp.lt.s32.totalorder %s4385_s4, %s4385_s4 }
0x1b02   :  { %v2617_v30 = vsel %vm77_vm0, %v2609_v27, 0.0 }
0x1b03   :  { %v2614_v23 = vsel %vm77_vm0, %v2608_v22, 0.0  ;;  %p4392_p3 = por %p4391_p2, %p4390_p1 }
0x1b04   :  { %2615 = vadd.xlane.f32.xlu1 %v2614_v23 }
0x1b05   :  { %p4393_p4 = pnand %p4392_p3, %p4386_p0 }
0x1b08   :  { %2618 = vadd.xlane.f32.xlu1 %v2617_v30 }
0x1b91   :  { %v2616_v32 = vpop.xlane.xlu1 %2615 }
0x1b92   :  { %v2620_v33 = vmul.f32 0.125, %v2616_v32 }
0x1b94   :  { %v2622_v37 = vsub.f32 %v2608_v22, %v2620_v33 }
0x1b95   :  { %v2619_v38 = vpop.xlane.xlu1 %2618 }
0x1b96   :  { %v2621_v1 = vmul.f32 0.125, %v2619_v38  ;;  %v2624_v41 = vmul.f32 %v2622_v37, %v2622_v37 }
0x1b98   :  { %v2623_v42 = vsub.f32 %v2609_v27, %v2621_v1  ;;  %v2626_v60 = vsel %vm77_vm0, %v2624_v41, 0.0 }
0x1b99   :  { %2627 = vadd.xlane.f32.xlu0 %v2626_v60 }
0x1b9a   :  { %v2625_v56 = vmul.f32 %v2623_v42, %v2623_v42 }
0x1b9c   :  { %v2629_v16 = vsel %vm77_vm0, %v2625_v56, 0.0 }
0x1b9d   :  { %2630 = vadd.xlane.f32.xlu1 %v2629_v16 }
0x1c26   :  { %v2628_v40 = vpop.xlane.xlu0 %2627 }
0x1c27   :  { %v2632_v35 = vmul.f32 0.125, %v2628_v40 }
0x1c29   :  { %v2634_v43 = vadd.f32 1e-05, %v2632_v35 }
0x1c2a   :  { %v2631_v17 = vpop.xlane.xlu1 %2630 }
0x1c2b   :  { %4325 = vrsqrt.f32 %v2634_v43  ;;  %v2633_v24 = vmul.f32 0.125, %v2631_v17 }
0x1c2d   :  { %v2635_v21 = vadd.f32 1e-05, %v2633_v24 }
0x1c2f   :  { %4327 = vrsqrt.f32 %v2635_v21 }
0x1c35   :  { %v4326_v44 = vpop.eup %4325 }
0x1c36   :  { %v2638_v28 = vmul.f32 %v4326_v44, %v2622_v37 }
0x1c38   :  { %v2646_v34 = vmul.f32 %v3669_v46, %v2638_v28 }
0x1c39   :  { %v4328_v47 = vpop.eup %4327 }
0x1c3a   :  { %v2639_v48 = vmul.f32 %v4328_v47, %v2623_v42  ;;  %v5082_v50 = vadd.f32 %v3670_v25, %v2646_v34 }
0x1c3c   :  { %v2647_v51 = vmul.f32 %v3669_v46, %v2639_v48  ;;  %4036 = vmatprep.mubr.msk.f32.mxu1 %vm77_vm0, %v5082_v50 }
0x1c3e   :  { %v5086_v53 = vadd.f32 %v3670_v25, %v2647_v51 }
0x1c40   :  { %4037 = vmatmul.mubr.msk.f32.vlgmr.msra.gmra.mrb[36].mxu1 %vm77_vm0, %v5086_v53 }
0x1d13   :  { %v4038_v55 = vpop.f32.mrb[36].mxu1 }
0x1d14   :  { %v2744_v57 = vadd.f32 %v4038_v55, %v3673_v54  ;;  %v2738_v59 = vpop.f32.mrb[37].mxu1 }
0x1d15   :  { %v2739_v52 = vadd.f32 %v3673_v54, %v2738_v59 }
0x1d16   :  { %v2748_v62 = vmul.f32 %v4892_v11, %v2744_v57  ;;  %v2750_v4 = vmul.f32 %v4906_v15, %v2744_v57  ;;  %v2752_v0 = vmul.f32 %v4920_v9, %v2744_v57  ;;  %v2754_v22 = vmul.f32 %v4934_v29, %v2744_v57 }
0x1d17   :  { %v5093_v61 = vpack.i.bf16 %v2744_v57, %v2739_v52  ;;  %v2747_v63 = vmul.f32 %v4879_v3, %v2739_v52  ;;  %v2749_v12 = vmul.f32 %v4898_v13, %v2739_v52  ;;  %v2751_v18 = vmul.f32 %v4912_v19, %v2739_v52 }
0x1d18   :  { %v2753_v14 = vmul.f32 %v4926_v26, %v2739_v52 }
0x1d19   :  { %4200 = vrot.lane.b32.xlu1 %v5093_v61, %s4409_s0  ;;  %4043 = vmatprep.mubr.msk.f32.mxu1 %vm77_vm0, %v2747_v63 }
0x1d8b   :  { %v4201_v58 = vpop.permute.xlu1 %4200 }
0x1d8c   :  { %v4203_v5 = vunpack.i.h.bf16 %v4201_v58  ;;  %v4202_v8 = vunpack.i.l.bf16 %v4201_v58 }
0x1d8e   :  { %v4146_v10 = vpack.c.bf16 %v4203_v5, %v4202_v8 }
0x1d90   :  { %4148 = vmatprep.subr.msk.bf16.mxu1 %vm4527_vm1, %v4146_v10 }
0x1d91   :  { %4151 = vmatpush3.bf16.xpose.msk.msra.mxu1 %vm4527_vm1, %v4146_v10 }
0x1d98   :  { %4044 = vmatmul.mubr.msk.f32.vlgmr.msra.gmra.mrb[38].mxu1 %vm77_vm0, %v2748_v62 }
0x1d99   :  { %4046 = vmatprep.mubr.msk.f32.mxu1 %vm77_vm0, %v2749_v12 }
0x1d9c   :  { %4047 = vmatmul.mubr.msk.f32.gmra.mrb[40].mxu1 %vm77_vm0, %v2750_v4 }
0x1d9d   :  { %4049 = vmatprep.mubr.msk.f32.mxu1 %vm77_vm0, %v2751_v18 }
0x1da0   :  { %4050 = vmatmul.mubr.msk.f32.gmra.mrb[42].mxu1 %vm77_vm0, %v2752_v0 }
0x1da1   :  { %4052 = vmatprep.mubr.msk.f32.mxu1 %vm77_vm0, %v2753_v14 }
0x1da4   :  { %4053 = vmatmul.mubr.msk.f32.gmra.mrb[44].mxu1 %vm77_vm0, %v2754_v22 }
0x1e6b   :  { %v4045_v23 = vpop.f32.mrb[38].mxu1 }
0x1e6c   :  { %v2895_v27 = vmul.f32 0.70710677, %v4045_v23  ;;  %v2855_v30 = vpop.f32.mrb[39].mxu1 }
0x1e6d   :  { %v2894_v32 = vmul.f32 0.70710677, %v2855_v30 }
0x1e6e   :  { %v2903_v33 = vadd.f32 %v4941_v36, %v2895_v27 }
0x1e6f   :  { %v4048_v37 = vpop.f32.mrb[40].mxu1  ;;  %v2902_v38 = vadd.f32 %v4947_v2, %v2894_v32 }
0x1e70   :  { %v2897_v1 = vmul.f32 0.70710677, %v4048_v37  ;;  %v2865_v41 = vpop.f32.mrb[41].mxu1  ;;  %v2913_v42 = vsel %vm322_vm2, %v2903_v33, -inf }
0x1e71   :  { %v2896_v60 = vmul.f32 0.70710677, %v2865_v41  ;;  %2914 = vmax.xlane.f32.xlu0 %v2913_v42  ;;  %v2910_v56 = vsel %vm322_vm2, %v2902_v38, -inf }
0x1e72   :  { %2911 = vmax.xlane.f32.xlu1 %v2910_v56  ;;  %v2905_v16 = vadd.f32 %v4955_v7, %v2897_v1 }
0x1e73   :  { %v4051_v20 = vpop.f32.mrb[42].mxu1  ;;  %v2904_v36 = vadd.f32 %v4962_v31, %v2896_v60 }
0x1e74   :  { %v2899_v40 = vmul.f32 0.70710677, %v4051_v20  ;;  %v2875_v35 = vpop.f32.mrb[43].mxu1  ;;  %v2919_v43 = vsel %vm322_vm2, %v2905_v16, -inf }
0x1e75   :  { %2920 = vmax.xlane.f32.xlu0 %v2919_v43  ;;  %v2898_v17 = vmul.f32 0.70710677, %v2875_v35  ;;  %v2916_v21 = vsel %vm322_vm2, %v2904_v36, -inf }
0x1e76   :  { %v2907_v44 = vadd.f32 %v4969_v49, %v2899_v40 }
0x1e77   :  { %v4054_v2 = vpop.f32.mrb[44].mxu1  ;;  %v2906_v7 = vadd.f32 %v4976_v39, %v2898_v17 }
0x1e78   :  { %v2885_v24 = vpop.f32.mrb[45].mxu1  ;;  %v2925_v28 = vsel %vm322_vm2, %v2907_v44, -inf  ;;  %v2901_v25 = vmul.f32 0.70710677, %v4054_v2 }
0x1e79   :  { %2917 = vmax.xlane.f32.xlu0 %v2916_v21  ;;  %v2900_v46 = vmul.f32 0.70710677, %v2885_v24  ;;  %v2922_v34 = vsel %vm322_vm2, %v2906_v7, -inf }
0x1e7a   :  { %v2909_v48 = vadd.f32 %v4990_v6, %v2901_v25 }
0x1e7b   :  { %v2908_v31 = vadd.f32 %v4983_v45, %v2900_v46 }
0x1e7c   :  { %v2931_v49 = vsel %vm322_vm2, %v2909_v48, -inf }
0x1e7d   :  { %2926 = vmax.xlane.f32.xlu0 %v2925_v28  ;;  %v2928_v47 = vsel %vm322_vm2, %v2908_v31, -inf }
0x1e81   :  { %2923 = vmax.xlane.f32.xlu0 %v2922_v34 }
0x1e85   :  { %2929 = vmax.xlane.f32.xlu0 %v2928_v47 }
0x1e89   :  { %2932 = vmax.xlane.f32.xlu0 %v2931_v49 }
0x1efe   :  { %v2915_v51 = vpop.xlane.xlu0 %2914 }
0x1eff   :  { %v2935_v54 = vsub.f32 %v2903_v33, %v2915_v51  ;;  %v2912_v55 = vpop.xlane.xlu1 %2911 }
0x1f00   :  { %v2934_v57 = vsub.f32 %v2902_v38, %v2912_v55 }
0x1f01   :  { %v2944_v39 = vmul.f32 1.442695, %v2935_v54 }
0x1f02   :  { %v2942_v59 = vmul.f32 1.442695, %v2934_v57  ;;  %v2921_v52 = vpop.xlane.xlu0 %2920 }
0x1f03   :  { %4329 = vpow2.f32 %v2944_v39  ;;  %v2937_v63 = vsub.f32 %v2905_v16, %v2921_v52 }
0x1f04   :  { %4331 = vpow2.f32 %v2942_v59 }
0x1f05   :  { %v2948_v45 = vmul.f32 1.442695, %v2937_v63 }
0x1f06   :  { %v2918_v58 = vpop.xlane.xlu0 %2917 }
0x1f07   :  { %4333 = vpow2.f32 %v2948_v45  ;;  %v2936_v5 = vsub.f32 %v2904_v36, %v2918_v58 }
0x1f09   :  { %v2946_v8 = vmul.f32 1.442695, %v2936_v5 }
0x1f0a   :  { %v2927_v6 = vpop.xlane.xlu0 %2926 }
0x1f0b   :  { %4335 = vpow2.f32 %v2946_v8  ;;  %v2939_v10 = vsub.f32 %v2907_v44, %v2927_v6 }
0x1f0d   :  { %v5133_v62 = vpop.eup %4329  ;;  %v2952_v12 = vmul.f32 1.442695, %v2939_v10 }
0x1f0e   :  { %v4332_v4 = vpop.eup %4331  ;;  %v2924_v18 = vpop.xlane.xlu0 %2923  ;;  %v2961_v0 = vsel %vm322_vm2, %v5133_v62, 0.0 }
0x1f0f   :  { %4337 = vpow2.f32 %v2952_v12  ;;  %v2938_v14 = vsub.f32 %v2906_v7, %v2924_v18  ;;  %2962 = vadd.xlane.f32.xlu1 %v2961_v0  ;;  %v2958_v22 = vsel %vm322_vm2, %v4332_v4, 0.0 }
0x1f10   :  { %2959 = vadd.xlane.f32.xlu0 %v2958_v22 }
0x1f11   :  { %v4334_v23 = vpop.eup %4333  ;;  %v2950_v27 = vmul.f32 1.442695, %v2938_v14 }
0x1f12   :  { %v2930_v30 = vpop.xlane.xlu0 %2929  ;;  %v2967_v32 = vsel %vm322_vm2, %v4334_v23, 0.0 }
0x1f13   :  { %4339 = vpow2.f32 %v2950_v27  ;;  %v2940_v33 = vsub.f32 %v2908_v31, %v2930_v30  ;;  %2968 = vadd.xlane.f32.xlu1 %v2967_v32 }
0x1f15   :  { %v4336_v37 = vpop.eup %4335  ;;  %v2954_v38 = vmul.f32 1.442695, %v2940_v33 }
0x1f16   :  { %v2933_v1 = vpop.xlane.xlu0 %2932  ;;  %v2964_v41 = vsel %vm322_vm2, %v4336_v37, 0.0 }
0x1f17   :  { %4341 = vpow2.f32 %v2954_v38  ;;  %v2941_v42 = vsub.f32 %v2909_v48, %v2933_v1  ;;  %2965 = vadd.xlane.f32.xlu0 %v2964_v41 }
0x1f19   :  { %v4338_v60 = vpop.eup %4337  ;;  %v2956_v56 = vmul.f32 1.442695, %v2941_v42 }
0x1f1a   :  { %v2973_v16 = vsel %vm322_vm2, %v4338_v60, 0.0 }
0x1f1b   :  { %4343 = vpow2.f32 %v2956_v56  ;;  %2974 = vadd.xlane.f32.xlu1 %v2973_v16 }
0x1f1d   :  { %v4340_v20 = vpop.eup %4339 }
0x1f1e   :  { %v2970_v40 = vsel %vm322_vm2, %v4340_v20, 0.0 }
0x1f1f   :  { %2971 = vadd.xlane.f32.xlu0 %v2970_v40 }
0x1f21   :  { %v4342_v35 = vpop.eup %4341 }
0x1f22   :  { %v2976_v43 = vsel %vm322_vm2, %v4342_v35, 0.0 }
0x1f23   :  { %2977 = vadd.xlane.f32.xlu0 %v2976_v43 }
0x1f25   :  { %v4344_v36 = vpop.eup %4343 }
0x1f26   :  { %v2979_v2 = vsel %vm322_vm2, %v4344_v36, 0.0 }
0x1f27   :  { %2980 = vadd.xlane.f32.xlu1 %v2979_v2 }
0x1f39   :  { %4205 = vrot.lane.b32.xlu0 %v5093_v61, %s4410_s28 }
0x1f9c   :  { %v2963_v44 = vpop.xlane.xlu1 %2962 }
0x1f9d   :  { %v2960_v17 = vpop.xlane.xlu0 %2959 }
0x1f9e   :  { %4345 = vrcp.f32 %v2960_v17 }
0x1f9f   :  { %4347 = vrcp.f32 %v2963_v44 }
0x1fa0   :  { %v2969_v7 = vpop.xlane.xlu1 %2968 }
0x1fa4   :  { %v2966_v21 = vpop.xlane.xlu0 %2965 }
0x1fa5   :  { %4349 = vrcp.f32 %v2966_v21 }
0x1fa6   :  { %4351 = vrcp.f32 %v2969_v7 }
0x1fa8   :  { %v4346_v24 = vpop.eup %4345  ;;  %v2975_v34 = vpop.xlane.xlu1 %2974 }
0x1fa9   :  { %v2990_v46 = vmul.f32 %v4346_v24, %v4332_v4  ;;  %v4348_v51 = vpop.eup %4347 }
0x1faa   :  { %v2991_v55 = vmul.f32 %v4348_v51, %v5133_v62  ;;  %v3694_v62 = vld [vmem:[%s5237_s5 + $0x18] sm:$0xff] }
0x1fab   :  { %4059 = vmatprep.mubr.msk.f32.mxu0 %vm322_vm2, %v2990_v46 }
0x1fac   :  { %v2972_v28 = vpop.xlane.xlu0 %2971 }
0x1fad   :  { %4353 = vrcp.f32 %v2972_v28 }
0x1fae   :  { %4355 = vrcp.f32 %v2975_v34  ;;  %v3709_v34 = vld [vmem:[%s5243_s11 + $0x68] sm:$0xff] }
0x1faf   :  { %v4350_v54 = vpop.eup %4349 }
0x1fb0   :  { %v2978_v25 = vpop.xlane.xlu0 %2977  ;;  %v4352_v57 = vpop.eup %4351  ;;  %v2992_v39 = vmul.f32 %v4350_v54, %v4336_v37 }
0x1fb1   :  { %4357 = vrcp.f32 %v2978_v25  ;;  %v2993_v52 = vmul.f32 %v4352_v57, %v4334_v23  ;;  %v3708_v25 = vld [vmem:[%s5243_s11 + $0x60] sm:$0xff] }
0x1fb2   :  { %v3701_v57 = vld [vmem:[%s5239_s7 + $0x3] ss:$0 sm:$0xff] }
0x1fb4   :  { %v4206_v31 = vpop.permute.xlu0 %4205  ;;  %v2981_v61 = vpop.xlane.xlu1 %2980 }
0x1fb5   :  { %v4208_v47 = vunpack.i.h.bf16 %v4206_v31  ;;  %v4207_v48 = vunpack.i.l.bf16 %v4206_v31  ;;  %4359 = vrcp.f32 %v2981_v61  ;;  %v4156_v31 = vpack.c.bf16 %v3709_v34, %v3708_v25 }
0x1fb7   :  { %v4152_v49 = vpack.c.bf16 %v4208_v47, %v4207_v48  ;;  %v4354_v59 = vpop.eup %4353 }
0x1fb8   :  { %v4356_v63 = vpop.eup %4355  ;;  %v2994_v45 = vmul.f32 %v4354_v59, %v4340_v20  ;;  %v3702_v59 = vld [vmem:[%s5240_s8 + $0x3] ss:$0 sm:$0xff] }
0x1fb9   :  { %4153 = vmatprep.subr.bf16.mxu0 %v4152_v49  ;;  %v2995_v5 = vmul.f32 %v4356_v63, %v4338_v60 }
0x1fba   :  { %4155 = vmatpush3.bf16.msra.mxu0 %v4152_v49 }
0x1fbb   :  { %v4358_v58 = vpop.eup %4357  ;;  %4071 = vmatprep.subr.mxu0 %v3694_v62 }
0x1fbc   :  { %v2996_v6 = vmul.f32 %v4358_v58, %v4342_v35 }
0x1fbd   :  { %4060 = vmatmul.mubr.msk.f32.vlgmr.msra.gmra.mrb[36].mxu0 %vm322_vm2, %v2991_v55 }
0x1fbe   :  { %4062 = vmatprep.mubr.msk.f32.mxu0 %vm322_vm2, %v2992_v39  ;;  %4072 = vmatpush3.msra.mxu0 %v3694_v62 }
0x1fbf   :  { %v4360_v8 = vpop.eup %4359  ;;  %4157 = vmatprep.subr.bf16.mxu0 %v4156_v31 }
0x1fc0   :  { %v2997_v10 = vmul.f32 %v4360_v8, %v4344_v36 }
0x1fc1   :  { %4063 = vmatmul.mubr.msk.f32.gmra.mrb[38].mxu0 %vm322_vm2, %v2993_v52 }
0x1fc2   :  { %4065 = vmatprep.mubr.msk.f32.mxu0 %vm322_vm2, %v2994_v45 }
0x1fc5   :  { %4066 = vmatmul.mubr.msk.f32.gmra.mrb[40].mxu0 %vm322_vm2, %v2995_v5 }
0x1fc6   :  { %4068 = vmatprep.mubr.msk.f32.mxu0 %vm322_vm2, %v2996_v6  ;;  %v3710_v6 = vld [vmem:[%s5243_s11 + $0x70] sm:$0xff] }
0x1fc9   :  { %4069 = vmatmul.mubr.msk.f32.gmra.mrb[42].mxu0 %vm322_vm2, %v2997_v10  ;;  %v3711_v10 = vld [vmem:[%s5243_s11 + $0x78] sm:$0xff] }
0x1fca   :  { %v4160_v62 = vpack.c.bf16 %v3711_v10, %v3710_v6 }
0x2090   :  { %v4061_v12 = vpop.f32.mrb[36].mxu0 }
0x2091   :  { %v3094_v4 = vpop.f32.mrb[37].mxu0  ;;  %v3134_v0 = vmul.f32 %v4892_v11, %v4061_v12  ;;  %v3705_v12 = vld [vmem:[%s5242_s10 + $0x3] ss:$0 sm:$0xff] }
0x2092   :  { %v3133_v23 = vmul.f32 %v4879_v3, %v3094_v4 }
0x2094   :  { %v4064_v18 = vpop.f32.mrb[38].mxu0 }
0x2095   :  { %v3136_v14 = vmul.f32 %v4906_v15, %v4064_v18  ;;  %v3104_v22 = vpop.f32.mrb[39].mxu0 }
0x2096   :  { %v3135_v27 = vmul.f32 %v4898_v13, %v3104_v22  ;;  %v3696_v13 = vld [vmem:[%s5238_s6 + $0x3] ss:$0 sm:$0xff] }
0x2097   :  { %v3142_v30 = vadd.f32 %v3136_v14, %v3134_v0 }
0x2098   :  { %v3141_v32 = vadd.f32 %v3135_v27, %v3133_v23  ;;  %v4067_v33 = vpop.f32.mrb[40].mxu0  ;;  %v3713_v27 = vld [vmem:[%s5244_s12 + $0x3] ss:$0 sm:$0xff] }
0x2099   :  { %v3138_v37 = vmul.f32 %v4920_v9, %v4067_v33  ;;  %v3114_v38 = vpop.f32.mrb[41].mxu0 }
0x209a   :  { %v3137_v1 = vmul.f32 %v4912_v19, %v3114_v38 }
0x209b   :  { %v3144_v41 = vadd.f32 %v3142_v30, %v3138_v37 }
0x209c   :  { %v3143_v42 = vadd.f32 %v3141_v32, %v3137_v1  ;;  %v4070_v60 = vpop.f32.mrb[42].mxu0 }
0x209d   :  { %v3140_v11 = vmul.f32 %v4934_v29, %v4070_v60  ;;  %v3124_v56 = vpop.f32.mrb[43].mxu0 }
0x209e   :  { %v3139_v15 = vmul.f32 %v4926_v26, %v3124_v56 }
0x209f   :  { %v3146_v16 = vadd.f32 %v3144_v41, %v3140_v11 }
0x20a0   :  { %v3145_v3 = vadd.f32 %v3143_v42, %v3139_v15 }
0x20a2   :  { %4073 = vmatprep.mubr.msk.f32.mxu0 %vm77_vm0, %v3145_v3 }
0x20a3   :  { %4074 = vmatmul.mubr.msk.f32.vlgmr.msra.gmra.mrb[44].mxu0 %vm77_vm0, %v3146_v16 }
0x20a4   :  { %4159 = vmatpush3.bf16.msra.mxu0 %v4156_v31 }
0x20a5   :  { %4161 = vmatprep.subr.bf16.mxu0 %v4160_v62 }
0x20a8   :  { %4163 = vmatpush3.bf16.msra.mxu0 %v4160_v62 }
0x2176   :  { %v4075_v9 = vpop.f32.mrb[44].mxu0 }
0x2177   :  { %v3229_v19 = vpop.f32.mrb[45].mxu0  ;;  %v3235_v20 = vadd.f32 %v4075_v9, %v3696_v13 }
0x2178   :  { %v3230_v40 = vadd.f32 %v3696_v13, %v3229_v19 }
0x2179   :  { %v3239_v29 = vadd.f32 %v3235_v20, %v5086_v53  ;;  %v3703_v53 = vld [vmem:[%s5241_s9 + $0x18] sm:$0xff] }
0x217a   :  { %v3238_v35 = vadd.f32 %v3230_v40, %v5082_v50  ;;  %4076 = vmatprep.subr.mxu1 %v3703_v53 }
0x217b   :  { %v3247_v43 = vsel %vm77_vm0, %v3239_v29, 0.0  ;;  %4077 = vmatpush3.msra.mxu1 %v3703_v53 }
0x217c   :  { %v3244_v26 = vsel %vm77_vm0, %v3238_v35, 0.0 }
0x217d   :  { %3245 = vadd.xlane.f32.xlu1 %v3244_v26 }
0x2181   :  { %3248 = vadd.xlane.f32.xlu1 %v3247_v43 }
0x220a   :  { %v3246_v36 = vpop.xlane.xlu1 %3245 }
0x220b   :  { %v3250_v2 = vmul.f32 0.125, %v3246_v36 }
0x220d   :  { %v3252_v17 = vsub.f32 %v3238_v35, %v3250_v2 }
0x220e   :  { %v3249_v24 = vpop.xlane.xlu1 %3248 }
0x220f   :  { %v3251_v21 = vmul.f32 0.125, %v3249_v24  ;;  %v3254_v44 = vmul.f32 %v3252_v17, %v3252_v17 }
0x2211   :  { %v3253_v46 = vsub.f32 %v3239_v29, %v3251_v21  ;;  %v3256_v28 = vsel %vm77_vm0, %v3254_v44, 0.0  ;;  %v3719_v21 = vld [vmem:[%s5246_s14 + $0x3] ss:$0 sm:$0xff] }
0x2212   :  { %3257 = vadd.xlane.f32.xlu1 %v3256_v28 }
0x2213   :  { %v3255_v7 = vmul.f32 %v3253_v46, %v3253_v46 }
0x2215   :  { %v3259_v50 = vsel %vm77_vm0, %v3255_v7, 0.0 }
0x2216   :  { %3260 = vadd.xlane.f32.xlu1 %v3259_v50 }
0x229f   :  { %v3258_v47 = vpop.xlane.xlu1 %3257 }
0x22a0   :  { %v3262_v48 = vmul.f32 0.125, %v3258_v47 }
0x22a2   :  { %v3264_v61 = vadd.f32 1e-05, %v3262_v48 }
0x22a3   :  { %v3261_v49 = vpop.xlane.xlu1 %3260 }
0x22a4   :  { %4361 = vrsqrt.f32 %v3264_v61  ;;  %v3263_v51 = vmul.f32 0.125, %v3261_v49 }
0x22a6   :  { %v3265_v54 = vadd.f32 1e-05, %v3263_v51 }
0x22a8   :  { %4363 = vrsqrt.f32 %v3265_v54 }
0x22ae   :  { %v4362_v55 = vpop.eup %4361 }
0x22af   :  { %v3268_v39 = vmul.f32 %v4362_v55, %v3252_v17  ;;  %v3718_v17 = vld [vmem:[%s5245_s13 + $0x3] ss:$0 sm:$0xff] }
0x22b1   :  { %v3276_v52 = vmul.f32 %v3701_v57, %v3268_v39 }
0x22b2   :  { %v4364_v63 = vpop.eup %4363 }
0x22b3   :  { %v3269_v45 = vmul.f32 %v4364_v63, %v3253_v46  ;;  %v3284_v58 = vadd.f32 %v3702_v59, %v3276_v52 }
0x22b5   :  { %v3277_v5 = vmul.f32 %v3701_v57, %v3269_v45  ;;  %4078 = vmatprep.mubr.msk.f32.mxu1 %vm77_vm0, %v3284_v58 }
0x22b7   :  { %v3285_v8 = vadd.f32 %v3702_v59, %v3277_v5 }
0x22b9   :  { %4079 = vmatmul.mubr.msk.f32.vlgmr.msra.gmra.mrb[46].mxu1 %vm77_vm0, %v3285_v8 }
0x238c   :  { %v4080_v4 = vpop.f32.mrb[46].mxu1 }
0x238d   :  { %v3374_v18 = vadd.f32 %v4080_v4, %v3705_v12  ;;  %v3368_v0 = vpop.f32.mrb[47].mxu1 }
0x238e   :  { %v3369_v14 = vadd.f32 %v3705_v12, %v3368_v0 }
0x238f   :  { %v3378_v23 = vmax.f32 %v3374_v18, 0.0 }
0x2390   :  { %v3377_v22 = vmax.f32 %v3369_v14, 0.0 }
0x2392   :  { %4089 = vmatprep.mubr.msk.f32.mxu0 %vm798_vm3, %v3377_v22 }
0x2393   :  { %4090 = vmatmul.mubr.msk.f32.vlgmr.msra.gmra.mrb[46].mxu0 %vm798_vm3, %v3378_v23 }
0x2466   :  { %v4091_v30 = vpop.f32.mrb[46].mxu0 }
0x2467   :  { %v3464_v32 = vpop.f32.mrb[47].mxu0  ;;  %v3470_v33 = vadd.f32 %v4091_v30, %v3713_v27 }
0x2468   :  { %v3465_v37 = vadd.f32 %v3713_v27, %v3464_v32 }
0x2469   :  { %v3474_v1 = vadd.f32 %v3470_v33, %v3285_v8 }
0x246a   :  { %v3473_v38 = vadd.f32 %v3465_v37, %v3284_v58 }
0x246b   :  { %v3482_v42 = vsel %vm77_vm0, %v3474_v1, 0.0 }
0x246c   :  { %v3479_v41 = vsel %vm77_vm0, %v3473_v38, 0.0 }
0x246d   :  { %3480 = vadd.xlane.f32.xlu1 %v3479_v41 }
0x2471   :  { %3483 = vadd.xlane.f32.xlu1 %v3482_v42 }
0x24fa   :  { %v3481_v60 = vpop.xlane.xlu1 %3480 }
0x24fb   :  { %v3485_v11 = vmul.f32 0.125, %v3481_v60 }
0x24fd   :  { %v3487_v56 = vsub.f32 %v3473_v38, %v3485_v11 }
0x24fe   :  { %v3484_v15 = vpop.xlane.xlu1 %3483 }
0x24ff   :  { %v3486_v16 = vmul.f32 0.125, %v3484_v15  ;;  %v3489_v3 = vmul.f32 %v3487_v56, %v3487_v56 }
0x2501   :  { %v3488_v13 = vsub.f32 %v3474_v1, %v3486_v16  ;;  %v3491_v9 = vsel %vm77_vm0, %v3489_v3, 0.0 }
0x2502   :  { %3492 = vadd.xlane.f32.xlu0 %v3491_v9 }
0x2503   :  { %v3490_v19 = vmul.f32 %v3488_v13, %v3488_v13 }
0x2505   :  { %v3494_v20 = vsel %vm77_vm0, %v3490_v19, 0.0 }
0x2506   :  { %3495 = vadd.xlane.f32.xlu1 %v3494_v20 }
0x258f   :  { %v3493_v40 = vpop.xlane.xlu0 %3492 }
0x2590   :  { %v3497_v35 = vmul.f32 0.125, %v3493_v40 }
0x2592   :  { %v3499_v29 = vadd.f32 1e-05, %v3497_v35 }
0x2593   :  { %v3496_v26 = vpop.xlane.xlu1 %3495 }
0x2594   :  { %4365 = vrsqrt.f32 %v3499_v29  ;;  %v3498_v43 = vmul.f32 0.125, %v3496_v26 }
0x2596   :  { %v3500_v36 = vadd.f32 1e-05, %v3498_v43 }
0x2598   :  { %4367 = vrsqrt.f32 %v3500_v36 }
0x259e   :  { %v4366_v2 = vpop.eup %4365 }
0x259f   :  { %v3503_v24 = vmul.f32 %v4366_v2, %v3487_v56 }
0x25a1   :  { %v3511_v44 = vmul.f32 %v3718_v17, %v3503_v24 }
0x25a2   :  { %v4368_v46 = vpop.eup %4367 }
0x25a3   :  { %v3504_v28 = vmul.f32 %v4368_v46, %v3488_v13  ;;  %v3519_v7 = vadd.f32 %v3719_v21, %v3511_v44 }
0x25a5   :  { %v3512_v50 = vmul.f32 %v3718_v17, %v3504_v28  ;;  %3521 = vst.msk [vmem:[#allocation2] sm:$0xff] %vm77_vm0, %v3519_v7 }
0x25a7   :  { %v3520_v53 = vadd.f32 %v3719_v21, %v3512_v50 }
0x25a9   :  { %3522 = vst.msk [vmem:[#allocation2 + $0x8] sm:$0xff] %vm77_vm0, %v3520_v53 }
0x25aa   :  { %4396 = shalt.err (!%p4393_p4)
}
0x25ab   :  { %s4397_s0 = scalar_lea.hbm %s5247_s15, 256 }
0x25ac   :  { %p4398_p5 = scmp.ne.s32.totalorder %s5247_s15, %s4397_s0  ;;  %p4401_p6 = scmp.lt.u32.totalorder %s4397_s0, %s5247_s15 }
0x25ae   :  { %p4403_p7 = pnand %p4401_p6, %p4398_p5 }
0x25b0   :  { %4406 = shalt.err (!%p4403_p7)
}
0x25b1   :  { %s4412_s19 = smov 128   ;;  %s4413_s20 = smov 8  }
0x25b2   :  { %3534 = dma.vmem_to_hbm [thread:$0]  %s3529_s17, 256, %s5247_s15, [#allocation3], %s4412_s19, %s4412_s19, %s4413_s20  }
0x25b3   :  { %4407 = dma.done.wait [#allocation3], 256  }
0x25b4   :  { %4408 = vsyncadd [#allocation3], 4294967040 }
0x25b5   :  { %3538 = vsyncpa [#allocation3], 1 }

</bundles_post_ra>
